<compile_context>
chip_gen: v6e
topology: v6e:2x2x1
jax: 0.10.0
libtpu: 0.0.40
codegen_flags: <defaults>
</compile_context>

<pallas_src>
import functools

import jax
import jax.numpy as jnp
from jax.experimental import pallas as pl
from jax.experimental.pallas import tpu as pltpu


# ----------------------------------------------------------------------------
# Fused kernel.  grid=(n_chunks,) streams the lin weight in K chunks; conv
# layers run once at k==0, down+softmax once at k==last, GEMV every step.
# ----------------------------------------------------------------------------
def _c51_kernel(tf_ref, w1e_ref, b1e_ref, w2m_ref, b2c_ref, wl_ref, bl_ref,
                wdt_ref, bd_ref, o_ref, h2f_ref, h3_ref,
                *, action_space, n_atoms, n_channels, n_chunks):
    f32 = jnp.float32
    k = pl.program_id(0)
    ch_per_chunk = n_channels // n_chunks

    # ---- step 0: both conv layers, lane-dense flatten, accumulator init ----
    @pl.when(k == 0)
    def _():
        # conv1 fused with conv2's im2col: (64,100)@(100,81) -> (64,81)
        p2t = jnp.dot(w1e_ref[...], tf_ref[...], preferred_element_type=f32)
        p2t = jnp.maximum(p2t + b1e_ref[...], 0.0)         # conv1 bias + ReLU
        # conv2: (32,64)@(64,81) -> (32,81); channel-major == NCHW flatten.
        h2 = jnp.dot(w2m_ref[...], p2t, preferred_element_type=f32)
        h2 = jnp.maximum(h2 + b2c_ref[...], 0.0)
        # Flatten each channel group into a lane-dense (1, ch*81) bf16 row so
        # the lin layer is one long-K bf16 MXU matmul per chunk (no VPU
        # weight upcast, no K=81 MXU padding).
        for chunk in range(n_chunks):
            base = chunk * ch_per_chunk
            pieces = [h2[base + c:base + c + 1, :] for c in range(ch_per_chunk)]
            h2f_ref[chunk] = jnp.concatenate(pieces, axis=1).astype(jnp.bfloat16)
        h3_ref[...] = bl_ref[...]                           # lin bias init

    # ---- every step: one bf16 GEMV chunk against the streamed wl block ----
    lhs = h2f_ref[0]
    for chunk in range(1, n_chunks):
        lhs = jnp.where(k == chunk, h2f_ref[chunk], lhs)    # (1, chunk_rows) bf16
    h3_ref[...] += jnp.dot(lhs, wl_ref[...], preferred_element_type=f32)

    # ---- last step: fused down + reshape(A, n_atoms) + softmax, one store --
    @pl.when(k == n_chunks - 1)
    def _():
        logits = jnp.dot(h3_ref[...], wdt_ref[...],
                         preferred_element_type=f32) + bd_ref[...]   # (1, A*n_atoms)
        rows = jnp.concatenate(
            [logits[:, a * n_atoms:(a + 1) * n_atoms] for a in range(action_space)],
            axis=0)                                                   # (A, n_atoms)
        m = jnp.max(rows, axis=1, keepdims=True)
        e = jnp.exp(rows - m)
        s = jnp.sum(e, axis=1, keepdims=True)
        o_ref[...] = (e / s).astype(o_ref.dtype)            # exact division


# ----------------------------------------------------------------------------
# One-time weight packing (keep OUT of the per-step jit — review item 5).
# ----------------------------------------------------------------------------
def pack_params(params, *, action_space, n_atoms, stride, conv2_stride=2):
    w1, b1, w2, b2, wl, bl, wd, bd = params
    c1_out, c1_in, kd, _ = w1.shape          # conv1: (4, 1, 4, 4)
    c2_out, c2_in, k2, _ = w2.shape          # conv2: (32, 4, 4, 4), stride 2
    assert c1_in == 1 and c2_in == c1_out
    n_hidden = wl.shape[0]                   # 512
    n_sp = wl.shape[1] // c2_out             # 81
    assert wl.shape[1] == c2_out * n_sp
    assert wd.shape == (action_space * n_atoms, n_hidden)
    ho2 = int(round(n_sp ** 0.5))
    assert ho2 * ho2 == n_sp

    # Expanded conv1 weight: applied to (win x win)/stride-sf input patches it
    # directly yields conv2's im2col matrix (ReLU applied after the GEMM).
    win = stride * (k2 - 1) + kd             # 10
    sf = stride * conv2_stride               # 4
    w1e = jnp.zeros((c1_out, k2, k2, win, win), jnp.float32)
    for kh in range(k2):
        for kw in range(k2):
            w1e = w1e.at[:, kh, kw,
                         stride * kh:stride * kh + kd,
                         stride * kw:stride * kw + kd].set(w1[:, 0])

    packed = dict(
        w1e=w1e.reshape(c1_out * k2 * k2, win * win),        # (64, 100) f32
        b1e=jnp.repeat(b1, k2 * k2)[:, None],                # (64, 1)   f32
        w2m=w2.reshape(c2_out, c1_out * k2 * k2),            # (32, 64)  f32
        b2c=b2[:, None],                                     # (32, 1)   f32
        wl_t=wl.T.astype(jnp.bfloat16),                      # (2592, 512) bf16, K = NCHW flatten
        blr=bl.reshape(1, n_hidden),                         # (1, 512)  f32
        wdt=wd.T.astype(jnp.float32),                        # (512, A*n_atoms) f32
        bdr=bd.reshape(1, action_space * n_atoms),           # (1, A*n_atoms)  f32
    )
    meta = dict(win=win, sf=sf, ho2=ho2, n_channels=c2_out, n_sp=n_sp,
                n_hidden=n_hidden)
    return packed, meta


# ----------------------------------------------------------------------------
# Forward wrapper: per-call work is only the tiny input-patch gather + one
# pallas_call.  All weights arrive pre-packed.
# ----------------------------------------------------------------------------
def value_distribution_forward(x, packed, *, action_space, n_atoms,
                               win, sf, ho2, n_channels, n_sp, n_hidden,
                               n_chunks=2):
    """x: NCHW float32, batch=1, channels=1 (implied by the module's reshape)."""
    B, C, H, W = x.shape
    assert B == 1 and C == 1, "module's reshape to (A, n_atoms) implies batch=1"
    assert (H - win) // sf + 1 == ho2 and (W - win) // sf + 1 == ho2

    w1e, b1e, w2m, b2c = packed["w1e"], packed["b1e"], packed["w2m"], packed["b2c"]
    wl_t, blr, wdt, bdr = packed["wl_t"], packed["blr"], packed["wdt"], packed["bdr"]

    assert n_channels % n_chunks == 0
    chunk_rows = (n_channels // n_chunks) * n_sp             # 1296
    assert chunk_rows % 16 == 0                              # bf16 sublane tiling
    assert wl_t.shape == (n_channels * n_sp, n_hidden)

    # Input patches: Tf[(r,s), (i,j)] = x[sf*i + r, sf*j + s]  -> (100, 81)
    xi = x[0, 0]
    idx = sf * jnp.arange(ho2)[None, :] + jnp.arange(win)[:, None]   # (win, ho2)
    patches = xi[idx[:, None, :, None], idx[None, :, None, :]]       # (win,win,ho2,ho2)
    tf = patches.reshape(win * win, n_sp)

    kernel = functools.partial(
        _c51_kernel, action_space=action_space, n_atoms=n_atoms,
        n_channels=n_channels, n_chunks=n_chunks)

    n_out = action_space * n_atoms
    flops = 2 * (w1e.shape[0] * w1e.shape[1] * n_sp
                 + w2m.shape[0] * w2m.shape[1] * n_sp
                 + wl_t.shape[0] * wl_t.shape[1]
                 + wdt.shape[0] * wdt.shape[1])
    bytes_accessed = sum(int(a.size * a.dtype.itemsize)
                         for a in (tf, w1e, b1e, w2m, b2c, wl_t, blr, wdt, bdr))
    bytes_accessed += n_out * 4

    const2d = lambda k: (0, 0)
    return pl.pallas_call(
        kernel,
        out_shape=jax.ShapeDtypeStruct((action_space, n_atoms), jnp.float32),
        grid=(n_chunks,),
        in_specs=[
            pl.BlockSpec(tf.shape, const2d),
            pl.BlockSpec(w1e.shape, const2d),
            pl.BlockSpec(b1e.shape, const2d),
            pl.BlockSpec(w2m.shape, const2d),
            pl.BlockSpec(b2c.shape, const2d),
            pl.BlockSpec((chunk_rows, n_hidden), lambda k: (k, 0)),  # streamed bf16 wl
            pl.BlockSpec(blr.shape, const2d),
            pl.BlockSpec(wdt.shape, const2d),
            pl.BlockSpec(bdr.shape, const2d),
        ],
        out_specs=pl.BlockSpec((action_space, n_atoms), const2d),
        scratch_shapes=[
            pltpu.VMEM((n_chunks, 1, chunk_rows), jnp.bfloat16),  # flattened h2 chunks
            pltpu.VMEM((1, n_hidden), jnp.float32),               # lin accumulator
        ],
        compiler_params=pltpu.CompilerParams(dimension_semantics=("arbitrary",)),
        cost_estimate=pl.CostEstimate(flops=flops, transcendentals=n_out,
                                      bytes_accessed=bytes_accessed),
    )(tf, w1e, b1e, w2m, b2c, wl_t, blr, wdt, bdr)


# ----------------------------------------------------------------------------
# Pure-JAX reference (PyTorch semantics).  quantize=True mimics the kernel's
# bf16 storage of the lin weight and bf16 cast of the flattened activation.
# ----------------------------------------------------------------------------
def reference_forward(x, params, *, action_space, n_atoms, stride, quantize=False):
    w1, b1, w2, b2, wl, bl, wd, bd = params
    dn1 = jax.lax.conv_dimension_numbers(x.shape, w1.shape, ("NCHW", "OIHW", "NCHW"))
    h = jax.lax.conv_general_dilated(x, w1, (stride, stride), "VALID",
                                     dimension_numbers=dn1)
    h = jnp.maximum(h + b1[None, :, None, None], 0.0)
    dn2 = jax.lax.conv_dimension_numbers(h.shape, w2.shape, ("NCHW", "OIHW", "NCHW"))
    h = jax.lax.conv_general_dilated(h, w2, (2, 2), "VALID", dimension_numbers=dn2)
    h = jnp.maximum(h + b2[None, :, None, None], 0.0)
    h = h.reshape(h.shape[0], -1)
    if quantize:
        h = h.astype(jnp.bfloat16).astype(jnp.float32)
        wl = wl.astype(jnp.bfloat16).astype(jnp.float32)
    h = h @ wl.T + bl
    h = h @ wd.T + bd
    h = h.reshape(action_space, n_atoms)
    return jax.nn.softmax(h, axis=1)


# ----------------------------------------------------------------------------
# Main
# ----------------------------------------------------------------------------
if __name__ == "__main__":
    KERNELS = 4        # conv1 out channels
    KERNEL_DIM = 4     # conv1 kernel size
    STRIDE = 2         # conv1 stride
    ACTION_SPACE = 4
    N_ATOMS = 16
    H = W = 42         # 42 -> conv1 20x20 -> conv2 9x9 (matches Linear(32*9*9, 512))

    key = jax.random.PRNGKey(0)
    ks = jax.random.split(key, 9)

    def init(k, shape, fan_in):
        bound = 1.0 / jnp.sqrt(float(fan_in))
        return jax.random.uniform(k, shape, jnp.float32, -bound, bound)

    w1 = init(ks[0], (KERNELS, 1, KERNEL_DIM, KERNEL_DIM), 1 * KERNEL_DIM * KERNEL_DIM)
    b1 = init(ks[1], (KERNELS,), 1 * KERNEL_DIM * KERNEL_DIM)
    w2 = init(ks[2], (32, KERNELS, 4, 4), KERNELS * 16)
    b2 = init(ks[3], (32,), KERNELS * 16)
    wl = init(ks[4], (512, 32 * 9 * 9), 32 * 9 * 9)
    bl = init(ks[5], (512,), 32 * 9 * 9)
    wd = init(ks[6], (ACTION_SPACE * N_ATOMS, 512), 512)
    bd = init(ks[7], (ACTION_SPACE * N_ATOMS,), 512)
    params = (w1, b1, w2, b2, wl, bl, wd, bd)

    x = jax.random.normal(ks[8], (1, 1, H, W), jnp.float32)  # NCHW, batch=1, 1 chan

    # One-time packing (item 5: outside the per-step jit).
    packed, meta = pack_params(params, action_space=ACTION_SPACE, n_atoms=N_ATOMS,
                               stride=STRIDE)

    fwd = jax.jit(functools.partial(
        value_distribution_forward,
        action_space=ACTION_SPACE, n_atoms=N_ATOMS,
        win=meta["win"], sf=meta["sf"], ho2=meta["ho2"],
        n_channels=meta["n_channels"], n_sp=meta["n_sp"],
        n_hidden=meta["n_hidden"], n_chunks=2))
    out = jax.block_until_ready(fwd(x, packed))

    # Tight check: reference with the kernel's bf16 weight/activation rounding.
    ref_q = reference_forward(x, params, action_space=ACTION_SPACE, n_atoms=N_ATOMS,
                              stride=STRIDE, quantize=True)
    # Loose check: full-f32 module semantics.
    ref_f = reference_forward(x, params, action_space=ACTION_SPACE, n_atoms=N_ATOMS,
                              stride=STRIDE, quantize=False)

    assert out.shape == (ACTION_SPACE, N_ATOMS)
    assert jnp.allclose(out, ref_q, atol=2e-3, rtol=2e-3), "mismatch vs bf16 reference"
    assert jnp.allclose(out, ref_f, atol=1e-2, rtol=1e-2), "mismatch vs f32 reference"
    assert jnp.allclose(jnp.sum(out, axis=1), 1.0, atol=1e-4), "rows must sum to 1"

    print("KERNEL_OK")
</pallas_src>

<mosaic_0001>
module attributes {stable_mosaic.version = 11 : i64} {
  func.func @_c51_kernel(%arg0: i32, %arg1: memref<100x81xf32, #tpu.memory_space<vmem>>, %arg2: memref<64x100xf32, #tpu.memory_space<vmem>>, %arg3: memref<64x1xf32, #tpu.memory_space<vmem>>, %arg4: memref<32x64xf32, #tpu.memory_space<vmem>>, %arg5: memref<32x1xf32, #tpu.memory_space<vmem>>, %arg6: memref<1296x512xbf16, #tpu.memory_space<vmem>>, %arg7: memref<1x512xf32, #tpu.memory_space<vmem>>, %arg8: memref<512x64xf32, #tpu.memory_space<vmem>>, %arg9: memref<1x64xf32, #tpu.memory_space<vmem>>, %arg10: memref<4x16xf32, #tpu.memory_space<vmem>>, %arg11: memref<2x1x1296xbf16, #tpu.memory_space<vmem>>, %arg12: memref<1x512xf32, #tpu.memory_space<vmem>>) attributes {dimension_semantics = [#tpu.dimension_semantics<arbitrary>], iteration_bounds = array<i64: 2>, scalar_prefetch = 0 : i64, scratch_operands = 2 : i64, tpu.core_type = #tpu.core_type<tc>, window_params = [{pipeline_mode = #tpu.pipeline_mode<synchronous>, transform_indices = @transform_0, window_bounds = array<i64: 100, 81>}, {pipeline_mode = #tpu.pipeline_mode<synchronous>, transform_indices = @transform_1, window_bounds = array<i64: 64, 100>}, {pipeline_mode = #tpu.pipeline_mode<synchronous>, transform_indices = @transform_2, window_bounds = array<i64: 64, 1>}, {pipeline_mode = #tpu.pipeline_mode<synchronous>, transform_indices = @transform_3, window_bounds = array<i64: 32, 64>}, {pipeline_mode = #tpu.pipeline_mode<synchronous>, transform_indices = @transform_4, window_bounds = array<i64: 32, 1>}, {transform_indices = @transform_5, window_bounds = array<i64: 1296, 512>}, {pipeline_mode = #tpu.pipeline_mode<synchronous>, transform_indices = @transform_6, window_bounds = array<i64: 1, 512>}, {pipeline_mode = #tpu.pipeline_mode<synchronous>, transform_indices = @transform_7, window_bounds = array<i64: 512, 64>}, {pipeline_mode = #tpu.pipeline_mode<synchronous>, transform_indices = @transform_8, window_bounds = array<i64: 1, 64>}, {pipeline_mode = #tpu.pipeline_mode<synchronous>, transform_indices = @transform_9, window_bounds = array<i64: 4, 16>}]} {
    %c0_i32 = arith.constant 0 : i32
    %0 = arith.cmpi eq, %arg0, %c0_i32 : i32
    %1 = arith.extui %0 : i1 to i32
    %c0_i32_0 = arith.constant 0 : i32
    %2 = arith.cmpi ne, %1, %c0_i32_0 : i32
    scf.if %2 {
      %c0_13 = arith.constant 0 : index
      %c0_14 = arith.constant 0 : index
      %17 = vector.load %arg2[%c0_13, %c0_14] : memref<64x100xf32, #tpu.memory_space<vmem>>, vector<64x100xf32>
      %c0_15 = arith.constant 0 : index
      %c0_16 = arith.constant 0 : index
      %18 = vector.load %arg1[%c0_15, %c0_16] : memref<100x81xf32, #tpu.memory_space<vmem>>, vector<100x81xf32>
      %cst_17 = arith.constant dense<0.000000e+00> : vector<64x81xf32>
      %19 = tpu.matmul %17, %18, %cst_17 {dimension_numbers = #tpu.dot_dimension_numbers<[1], [0], [0], [1], [0, 0, 1, 1], [], []>} : vector<64x100xf32>, vector<100x81xf32>, vector<64x81xf32> -> vector<64x81xf32>
      %c0_18 = arith.constant 0 : index
      %c0_19 = arith.constant 0 : index
      %20 = vector.load %arg3[%c0_18, %c0_19] : memref<64x1xf32, #tpu.memory_space<vmem>>, vector<64x1xf32>
      %21 = vector.broadcast %20 : vector<64x1xf32> to vector<64x81xf32>
      %22 = arith.addf %19, %21 : vector<64x81xf32>
      %cst_20 = arith.constant 0.000000e+00 : f32
      %23 = vector.broadcast %cst_20 : f32 to vector<64x81xf32>
      %24 = arith.maximumf %22, %23 : vector<64x81xf32>
      %c0_21 = arith.constant 0 : index
      %c0_22 = arith.constant 0 : index
      %25 = vector.load %arg4[%c0_21, %c0_22] : memref<32x64xf32, #tpu.memory_space<vmem>>, vector<32x64xf32>
      %cst_23 = arith.constant dense<0.000000e+00> : vector<32x81xf32>
      %26 = tpu.matmul %25, %24, %cst_23 {dimension_numbers = #tpu.dot_dimension_numbers<[1], [0], [0], [1], [0, 0, 1, 1], [], []>} : vector<32x64xf32>, vector<64x81xf32>, vector<32x81xf32> -> vector<32x81xf32>
      %c0_24 = arith.constant 0 : index
      %c0_25 = arith.constant 0 : index
      %27 = vector.load %arg5[%c0_24, %c0_25] : memref<32x1xf32, #tpu.memory_space<vmem>>, vector<32x1xf32>
      %28 = vector.broadcast %27 : vector<32x1xf32> to vector<32x81xf32>
      %29 = arith.addf %26, %28 : vector<32x81xf32>
      %cst_26 = arith.constant 0.000000e+00 : f32
      %30 = vector.broadcast %cst_26 : f32 to vector<32x81xf32>
      %31 = arith.maximumf %29, %30 : vector<32x81xf32>
      %32 = vector.extract_strided_slice %31 {offsets = [0, 0], sizes = [1, 81], strides = [1, 1]} : vector<32x81xf32> to vector<1x81xf32>
      %33 = vector.extract_strided_slice %31 {offsets = [1, 0], sizes = [1, 81], strides = [1, 1]} : vector<32x81xf32> to vector<1x81xf32>
      %34 = vector.extract_strided_slice %31 {offsets = [2, 0], sizes = [1, 81], strides = [1, 1]} : vector<32x81xf32> to vector<1x81xf32>
      %35 = vector.extract_strided_slice %31 {offsets = [3, 0], sizes = [1, 81], strides = [1, 1]} : vector<32x81xf32> to vector<1x81xf32>
      %36 = vector.extract_strided_slice %31 {offsets = [4, 0], sizes = [1, 81], strides = [1, 1]} : vector<32x81xf32> to vector<1x81xf32>
      %37 = vector.extract_strided_slice %31 {offsets = [5, 0], sizes = [1, 81], strides = [1, 1]} : vector<32x81xf32> to vector<1x81xf32>
      %38 = vector.extract_strided_slice %31 {offsets = [6, 0], sizes = [1, 81], strides = [1, 1]} : vector<32x81xf32> to vector<1x81xf32>
      %39 = vector.extract_strided_slice %31 {offsets = [7, 0], sizes = [1, 81], strides = [1, 1]} : vector<32x81xf32> to vector<1x81xf32>
      %40 = vector.extract_strided_slice %31 {offsets = [8, 0], sizes = [1, 81], strides = [1, 1]} : vector<32x81xf32> to vector<1x81xf32>
      %41 = vector.extract_strided_slice %31 {offsets = [9, 0], sizes = [1, 81], strides = [1, 1]} : vector<32x81xf32> to vector<1x81xf32>
      %42 = vector.extract_strided_slice %31 {offsets = [10, 0], sizes = [1, 81], strides = [1, 1]} : vector<32x81xf32> to vector<1x81xf32>
      %43 = vector.extract_strided_slice %31 {offsets = [11, 0], sizes = [1, 81], strides = [1, 1]} : vector<32x81xf32> to vector<1x81xf32>
      %44 = vector.extract_strided_slice %31 {offsets = [12, 0], sizes = [1, 81], strides = [1, 1]} : vector<32x81xf32> to vector<1x81xf32>
      %45 = vector.extract_strided_slice %31 {offsets = [13, 0], sizes = [1, 81], strides = [1, 1]} : vector<32x81xf32> to vector<1x81xf32>
      %46 = vector.extract_strided_slice %31 {offsets = [14, 0], sizes = [1, 81], strides = [1, 1]} : vector<32x81xf32> to vector<1x81xf32>
      %47 = vector.extract_strided_slice %31 {offsets = [15, 0], sizes = [1, 81], strides = [1, 1]} : vector<32x81xf32> to vector<1x81xf32>
      %48 = tpu.concatenate %32, %33, %34, %35, %36, %37, %38, %39, %40, %41, %42, %43, %44, %45, %46, %47 in 1 : vector<1x81xf32>, vector<1x81xf32>, vector<1x81xf32>, vector<1x81xf32>, vector<1x81xf32>, vector<1x81xf32>, vector<1x81xf32>, vector<1x81xf32>, vector<1x81xf32>, vector<1x81xf32>, vector<1x81xf32>, vector<1x81xf32>, vector<1x81xf32>, vector<1x81xf32>, vector<1x81xf32>, vector<1x81xf32> -> vector<1x1296xf32>
      %49 = arith.truncf %48 : vector<1x1296xf32> to vector<1x1296xbf16>
      %c0_27 = arith.constant 0 : index
      %c0_28 = arith.constant 0 : index
      %c0_29 = arith.constant 0 : index
      %50 = vector.load %arg11[%c0_27, %c0_28, %c0_29] : memref<2x1x1296xbf16, #tpu.memory_space<vmem>>, vector<1x1x1296xbf16>
      %51 = vector.shape_cast %50 : vector<1x1x1296xbf16> to vector<1x1296xbf16>
      %52 = vector.shape_cast %49 : vector<1x1296xbf16> to vector<1x1x1296xbf16>
      tpu.vector_store %arg11[%c0_27, %c0_28, %c0_29], %52 {strides = array<i32>} : memref<2x1x1296xbf16, #tpu.memory_space<vmem>>, vector<1x1x1296xbf16>,
      %53 = vector.extract_strided_slice %31 {offsets = [16, 0], sizes = [1, 81], strides = [1, 1]} : vector<32x81xf32> to vector<1x81xf32>
      %54 = vector.extract_strided_slice %31 {offsets = [17, 0], sizes = [1, 81], strides = [1, 1]} : vector<32x81xf32> to vector<1x81xf32>
      %55 = vector.extract_strided_slice %31 {offsets = [18, 0], sizes = [1, 81], strides = [1, 1]} : vector<32x81xf32> to vector<1x81xf32>
      %56 = vector.extract_strided_slice %31 {offsets = [19, 0], sizes = [1, 81], strides = [1, 1]} : vector<32x81xf32> to vector<1x81xf32>
      %57 = vector.extract_strided_slice %31 {offsets = [20, 0], sizes = [1, 81], strides = [1, 1]} : vector<32x81xf32> to vector<1x81xf32>
      %58 = vector.extract_strided_slice %31 {offsets = [21, 0], sizes = [1, 81], strides = [1, 1]} : vector<32x81xf32> to vector<1x81xf32>
      %59 = vector.extract_strided_slice %31 {offsets = [22, 0], sizes = [1, 81], strides = [1, 1]} : vector<32x81xf32> to vector<1x81xf32>
      %60 = vector.extract_strided_slice %31 {offsets = [23, 0], sizes = [1, 81], strides = [1, 1]} : vector<32x81xf32> to vector<1x81xf32>
      %61 = vector.extract_strided_slice %31 {offsets = [24, 0], sizes = [1, 81], strides = [1, 1]} : vector<32x81xf32> to vector<1x81xf32>
      %62 = vector.extract_strided_slice %31 {offsets = [25, 0], sizes = [1, 81], strides = [1, 1]} : vector<32x81xf32> to vector<1x81xf32>
      %63 = vector.extract_strided_slice %31 {offsets = [26, 0], sizes = [1, 81], strides = [1, 1]} : vector<32x81xf32> to vector<1x81xf32>
      %64 = vector.extract_strided_slice %31 {offsets = [27, 0], sizes = [1, 81], strides = [1, 1]} : vector<32x81xf32> to vector<1x81xf32>
      %65 = vector.extract_strided_slice %31 {offsets = [28, 0], sizes = [1, 81], strides = [1, 1]} : vector<32x81xf32> to vector<1x81xf32>
      %66 = vector.extract_strided_slice %31 {offsets = [29, 0], sizes = [1, 81], strides = [1, 1]} : vector<32x81xf32> to vector<1x81xf32>
      %67 = vector.extract_strided_slice %31 {offsets = [30, 0], sizes = [1, 81], strides = [1, 1]} : vector<32x81xf32> to vector<1x81xf32>
      %68 = vector.extract_strided_slice %31 {offsets = [31, 0], sizes = [1, 81], strides = [1, 1]} : vector<32x81xf32> to vector<1x81xf32>
      %69 = tpu.concatenate %53, %54, %55, %56, %57, %58, %59, %60, %61, %62, %63, %64, %65, %66, %67, %68 in 1 : vector<1x81xf32>, vector<1x81xf32>, vector<1x81xf32>, vector<1x81xf32>, vector<1x81xf32>, vector<1x81xf32>, vector<1x81xf32>, vector<1x81xf32>, vector<1x81xf32>, vector<1x81xf32>, vector<1x81xf32>, vector<1x81xf32>, vector<1x81xf32>, vector<1x81xf32>, vector<1x81xf32>, vector<1x81xf32> -> vector<1x1296xf32>
      %70 = arith.truncf %69 : vector<1x1296xf32> to vector<1x1296xbf16>
      %c1_30 = arith.constant 1 : index
      %c0_31 = arith.constant 0 : index
      %c0_32 = arith.constant 0 : index
      %71 = vector.load %arg11[%c1_30, %c0_31, %c0_32] : memref<2x1x1296xbf16, #tpu.memory_space<vmem>>, vector<1x1x1296xbf16>
      %72 = vector.shape_cast %71 : vector<1x1x1296xbf16> to vector<1x1296xbf16>
      %73 = vector.shape_cast %70 : vector<1x1296xbf16> to vector<1x1x1296xbf16>
      tpu.vector_store %arg11[%c1_30, %c0_31, %c0_32], %73 {strides = array<i32>} : memref<2x1x1296xbf16, #tpu.memory_space<vmem>>, vector<1x1x1296xbf16>,
      %c0_33 = arith.constant 0 : index
      %c0_34 = arith.constant 0 : index
      %74 = vector.load %arg7[%c0_33, %c0_34] : memref<1x512xf32, #tpu.memory_space<vmem>>, vector<1x512xf32>
      %c0_35 = arith.constant 0 : index
      %c0_36 = arith.constant 0 : index
      %75 = vector.load %arg12[%c0_35, %c0_36] : memref<1x512xf32, #tpu.memory_space<vmem>>, vector<1x512xf32>
      tpu.vector_store %arg12[%c0_35, %c0_36], %74 {strides = array<i32>} : memref<1x512xf32, #tpu.memory_space<vmem>>, vector<1x512xf32>,
    } else {
    }
    %c0 = arith.constant 0 : index
    %c0_1 = arith.constant 0 : index
    %c0_2 = arith.constant 0 : index
    %3 = vector.load %arg11[%c0, %c0_1, %c0_2] : memref<2x1x1296xbf16, #tpu.memory_space<vmem>>, vector<1x1x1296xbf16>
    %4 = vector.shape_cast %3 : vector<1x1x1296xbf16> to vector<1x1296xbf16>
    %c1_i32 = arith.constant 1 : i32
    %5 = arith.cmpi eq, %arg0, %c1_i32 : i32
    %c1 = arith.constant 1 : index
    %c0_3 = arith.constant 0 : index
    %c0_4 = arith.constant 0 : index
    %6 = vector.load %arg11[%c1, %c0_3, %c0_4] : memref<2x1x1296xbf16, #tpu.memory_space<vmem>>, vector<1x1x1296xbf16>
    %7 = vector.shape_cast %6 : vector<1x1x1296xbf16> to vector<1x1296xbf16>
    %8 = arith.select %5, %7, %4 : vector<1x1296xbf16>
    %c0_5 = arith.constant 0 : index
    %c0_6 = arith.constant 0 : index
    %9 = vector.load %arg12[%c0_5, %c0_6] : memref<1x512xf32, #tpu.memory_space<vmem>>, vector<1x512xf32>
    %c0_7 = arith.constant 0 : index
    %c0_8 = arith.constant 0 : index
    %10 = vector.load %arg6[%c0_7, %c0_8] : memref<1296x512xbf16, #tpu.memory_space<vmem>>, vector<1296x512xbf16>
    %cst = arith.constant dense<0.000000e+00> : vector<1x512xf32>
    %11 = tpu.matmul %8, %10, %cst {dimension_numbers = #tpu.dot_dimension_numbers<[1], [0], [0], [1], [0, 0, 1, 1], [], []>} : vector<1x1296xbf16>, vector<1296x512xbf16>, vector<1x512xf32> -> vector<1x512xf32>
    %12 = arith.addf %9, %11 : vector<1x512xf32>
    %c0_9 = arith.constant 0 : index
    %c0_10 = arith.constant 0 : index
    %13 = vector.load %arg12[%c0_9, %c0_10] : memref<1x512xf32, #tpu.memory_space<vmem>>, vector<1x512xf32>
    tpu.vector_store %arg12[%c0_9, %c0_10], %12 {strides = array<i32>} : memref<1x512xf32, #tpu.memory_space<vmem>>, vector<1x512xf32>,
    %c1_i32_11 = arith.constant 1 : i32
    %14 = arith.cmpi eq, %arg0, %c1_i32_11 : i32
    %15 = arith.extui %14 : i1 to i32
    %c0_i32_12 = arith.constant 0 : i32
    %16 = arith.cmpi ne, %15, %c0_i32_12 : i32
    scf.if %16 {
      %c0_13 = arith.constant 0 : index
      %c0_14 = arith.constant 0 : index
      %17 = vector.load %arg12[%c0_13, %c0_14] : memref<1x512xf32, #tpu.memory_space<vmem>>, vector<1x512xf32>
      %c0_15 = arith.constant 0 : index
      %c0_16 = arith.constant 0 : index
      %18 = vector.load %arg8[%c0_15, %c0_16] : memref<512x64xf32, #tpu.memory_space<vmem>>, vector<512x64xf32>
      %cst_17 = arith.constant dense<0.000000e+00> : vector<1x64xf32>
      %19 = tpu.matmul %17, %18, %cst_17 {dimension_numbers = #tpu.dot_dimension_numbers<[1], [0], [0], [1], [0, 0, 1, 1], [], []>} : vector<1x512xf32>, vector<512x64xf32>, vector<1x64xf32> -> vector<1x64xf32>
      %c0_18 = arith.constant 0 : index
      %c0_19 = arith.constant 0 : index
      %20 = vector.load %arg9[%c0_18, %c0_19] : memref<1x64xf32, #tpu.memory_space<vmem>>, vector<1x64xf32>
      %21 = arith.addf %19, %20 : vector<1x64xf32>
      %22 = vector.extract_strided_slice %21 {offsets = [0, 0], sizes = [1, 16], strides = [1, 1]} : vector<1x64xf32> to vector<1x16xf32>
      %23 = vector.extract_strided_slice %21 {offsets = [0, 16], sizes = [1, 16], strides = [1, 1]} : vector<1x64xf32> to vector<1x16xf32>
      %24 = vector.extract_strided_slice %21 {offsets = [0, 32], sizes = [1, 16], strides = [1, 1]} : vector<1x64xf32> to vector<1x16xf32>
      %25 = vector.extract_strided_slice %21 {offsets = [0, 48], sizes = [1, 16], strides = [1, 1]} : vector<1x64xf32> to vector<1x16xf32>
      %26 = tpu.concatenate %22, %23, %24, %25 in 0 : vector<1x16xf32>, vector<1x16xf32>, vector<1x16xf32>, vector<1x16xf32> -> vector<4x16xf32>
      %cst_20 = arith.constant dense<0xFF800000> : vector<4xf32>
      %27 = vector.multi_reduction <maximumf>, %26, %cst_20 [1] : vector<4x16xf32> to vector<4xf32>
      %28 = vector.shape_cast %27 : vector<4xf32> to vector<4x1xf32>
      %29 = vector.broadcast %28 : vector<4x1xf32> to vector<4x16xf32>
      %30 = arith.subf %26, %29 : vector<4x16xf32>
      %31 = math.exp %30 : vector<4x16xf32>
      %cst_21 = arith.constant dense<0.000000e+00> : vector<4xf32>
      %32 = vector.multi_reduction <add>, %31, %cst_21 [1] : vector<4x16xf32> to vector<4xf32>
      %33 = vector.shape_cast %32 : vector<4xf32> to vector<4x1xf32>
      %34 = vector.broadcast %33 : vector<4x1xf32> to vector<4x16xf32>
      %35 = arith.divf %31, %34 : vector<4x16xf32>
      %c0_22 = arith.constant 0 : index
      %c0_23 = arith.constant 0 : index
      %36 = vector.load %arg10[%c0_22, %c0_23] : memref<4x16xf32, #tpu.memory_space<vmem>>, vector<4x16xf32>
      tpu.vector_store %arg10[%c0_22, %c0_23], %35 {strides = array<i32>} : memref<4x16xf32, #tpu.memory_space<vmem>>, vector<4x16xf32>,
    } else {
    }
    return
  }
  func.func @transform_0(%arg0: i32) -> (i32, i32) {
    %c0_i32 = arith.constant 0 : i32
    %c0_i32_0 = arith.constant 0 : i32
    %c0_i32_1 = arith.constant 0 : i32
    return %c0_i32, %c0_i32_0 : i32, i32
  }
  func.func @transform_1(%arg0: i32) -> (i32, i32) {
    %c0_i32 = arith.constant 0 : i32
    %c0_i32_0 = arith.constant 0 : i32
    %c0_i32_1 = arith.constant 0 : i32
    return %c0_i32, %c0_i32_0 : i32, i32
  }
  func.func @transform_2(%arg0: i32) -> (i32, i32) {
    %c0_i32 = arith.constant 0 : i32
    %c0_i32_0 = arith.constant 0 : i32
    %c0_i32_1 = arith.constant 0 : i32
    return %c0_i32, %c0_i32_0 : i32, i32
  }
  func.func @transform_3(%arg0: i32) -> (i32, i32) {
    %c0_i32 = arith.constant 0 : i32
    %c0_i32_0 = arith.constant 0 : i32
    %c0_i32_1 = arith.constant 0 : i32
    return %c0_i32, %c0_i32_0 : i32, i32
  }
  func.func @transform_4(%arg0: i32) -> (i32, i32) {
    %c0_i32 = arith.constant 0 : i32
    %c0_i32_0 = arith.constant 0 : i32
    %c0_i32_1 = arith.constant 0 : i32
    return %c0_i32, %c0_i32_0 : i32, i32
  }
  func.func @transform_5(%arg0: i32) -> (i32, i32) {
    %c0_i32 = arith.constant 0 : i32
    %c0_i32_0 = arith.constant 0 : i32
    return %arg0, %c0_i32 : i32, i32
  }
  func.func @transform_6(%arg0: i32) -> (i32, i32) {
    %c0_i32 = arith.constant 0 : i32
    %c0_i32_0 = arith.constant 0 : i32
    %c0_i32_1 = arith.constant 0 : i32
    return %c0_i32, %c0_i32_0 : i32, i32
  }
  func.func @transform_7(%arg0: i32) -> (i32, i32) {
    %c0_i32 = arith.constant 0 : i32
    %c0_i32_0 = arith.constant 0 : i32
    %c0_i32_1 = arith.constant 0 : i32
    return %c0_i32, %c0_i32_0 : i32, i32
  }
  func.func @transform_8(%arg0: i32) -> (i32, i32) {
    %c0_i32 = arith.constant 0 : i32
    %c0_i32_0 = arith.constant 0 : i32
    %c0_i32_1 = arith.constant 0 : i32
    return %c0_i32, %c0_i32_0 : i32, i32
  }
  func.func @transform_9(%arg0: i32) -> (i32, i32) {
    %c0_i32 = arith.constant 0 : i32
    %c0_i32_0 = arith.constant 0 : i32
    %c0_i32_1 = arith.constant 0 : i32
    return %c0_i32, %c0_i32_0 : i32, i32
  }
}

</mosaic_0001>

<bundles_post_ra>
// kernel: value_distribution_forward.1
= control target key start
LH: loop header
LB: loop body
LE: loop exit
PB: predicated region body
PF: predicated region fallthrough
CT: control target
= control target key end

     0   :  { %14 = vsyncpa [#allocation5], 0  ;;  %s6430_s0 = inlined_call_operand.vmem [shape: f32[100,81], index: 0, kind: input, shape index: {}]   ;;  %s6431_s1 = inlined_call_operand.vmem [shape: f32[64,100], index: 1, kind: input, shape index: {}]   ;;  %s6432_s2 = inlined_call_operand.vmem [shape: f32[64,1], index: 2, kind: input, shape index: {}]   ;;  %s6433_s3 = inlined_call_operand.vmem [shape: f32[32,64], index: 3, kind: input, shape index: {}]   ;;  %s6434_s4 = inlined_call_operand.vmem [shape: f32[32,1], index: 4, kind: input, shape index: {}]   ;;  %s6435_s5 = inlined_call_operand.hbm [shape: bf16[2592,512], index: 5, kind: input, shape index: {}]   ;;  %s6436_s6 = inlined_call_operand.vmem [shape: f32[1,512], index: 6, kind: input, shape index: {}]   ;;  %s6437_s7 = inlined_call_operand.vmem [shape: f32[512,64], index: 7, kind: input, shape index: {}]   ;;  %s6438_s8 = inlined_call_operand.vmem [shape: f32[1,64], index: 8, kind: input, shape index: {}]   ;;  %s6439_s9 = inlined_call_operand.hbm [shape: f32[4,16], index: 9, kind: output, shape index: {}]  }
   0x1   :  { %16 = vsyncpa [#allocation5 + $0x1], 0 }
   0x2   :  { %17 = vsyncpa [#allocation6], 0  ;;  %s5327_s30 = smov 0   ;;  %s5329_s10 = smov 0  }
   0x3   :  { %s5331_s11 = smov 0   ;;  %s5333_s12 = smov 0  }
   0x4 LB: > { %s5346_s13 = sadd.s32 4294967295, %s5249_s12   ;;  %s5349_s14 = sadd.s32 1, %s5249_s12   ;;  %s5249_s12 = sphi %s5333_s12, %s6496_s12   ;;  %s5245_s11 = sphi %s5331_s11, %s6495_s11   ;;  %s5241_s10 = sphi %s5329_s10, %s6494_s10   ;;  %s5237_s30 = sphi %s5327_s30, %s6493_s30  }
   0x5   : > { %s132_s15 = ssub.s32 %s5249_s12, %s5349_s14  ;;  %s135_s16 = sadd.s32 1, %s5245_s11 }
   0x6   : > { %p133_p0 = scmp.eq.s32.totalorder %s132_s15, 0  ;;  %p142_p1 = scmp.ne.s32.totalorder %s5245_s11, %s5241_s10 }
   0x7   : > { %p143_p2 = scmp.eq.s32.totalorder %s5249_s12, 0  ;;  %p148_p3 = scmp.ne.s32.totalorder %s5241_s10, %s5237_s30 }
   0x8   : > { %s5359_s17 = scalar_select %p133_p0, %s5245_s11, %s135_s16  }
   0x9   : > { %p144_p4 = por %p143_p2, %p142_p1  ;;  %p149_p5 = scmp.eq.s32.totalorder %s5346_s13, 0 }
   0xa   : > { %p4532_p6 = scmp.lt.s32.totalorder %s5249_s12, 2  ;;  %s280_s19 = sand.u32 1, %s5245_s11  }
   0xb   : > { %p5363_p7 = por %p149_p5, %p148_p3  ;;  %s4520_s20 = smul.u32 2592, %s280_s19 }
   0xc   : > { %s4356_s21 = smul.u32 41472, %s5249_s12  ;;  %p5369_p8 = pnand %p4532_p6, %p144_p4 }
   0xd   : > { %s6443_s18 = scalar_select %p5363_p7, 1, 0 }
   0xe   : > { %s5376_s25 = scalar_lea.hbm %s6435_s5, %s4356_s21  ;;  %s284_s26 = scalar_lea.vmem [#allocation4], %s4520_s20 }
   0xf   : > { %s292_s27 = sshll.u32 %s284_s26, 4  ;;  %s5381_s28 = scalar_lea.sflag [#allocation5], %s280_s19  ;;  %s5378_s27 = int_to_ptr.vmem [resolvable:$true] %s292_s27 }
  0x10   : > { %s5159_s29 = scalar_lea.hbm %s5376_s25, 41472  ;;  %p5161_p11 = pneg %p5369_p8 }
  0x11   : > { %p5160_p10 = scmp.ne.s32.totalorder %s5376_s25, %s5159_s29  ;;  %s5164_s16 = scalar_lea.hbm %s6435_s5, 82944 }
  0x12   : > { %p5165_p0 = scmp.lt.s32.totalorder %s5376_s25, %s6435_s5  ;;  %p5166_p1 = scmp.lt.s32.totalorder %s5164_s16, %s5159_s29 }
  0x13   : > { %p5162_p12 = pnand %p5161_p11, %p5160_p10 }
  0x14   : > { %p5167_p2 = por %p5166_p1, %p5165_p0 }
  0x15   : > { %p5163_p13 = pneg %p5162_p12 }
  0x17   : > { %p5168_p3 = pnand %p5167_p2, %p5163_p13 }
  0x19   : > { %5171 = shalt.err (!%p5168_p3)
}
  0x1a   : > { %s5172_s19 = scalar_lea.vmem %s5378_s27, 41472  ;;  %s5251_s20 = smov [#allocation4]  }
  0x1b   : > { %p5173_p4 = scmp.ne.s32.totalorder %s5378_s27, %s5172_s19  ;;  %s5177_s24 = sshll.u32 %s5251_s20, 4  ;;  %s5178_s24 = int_to_ptr.vmem [resolvable:$false] %s5177_s24 }
  0x1c   : > { %s5179_s26 = scalar_lea.vmem %s5178_s24, 82944  ;;  %p5180_p10 = scmp.lt.s32.totalorder %s5378_s27, %s5178_s24 }
  0x1d   : > { %p5175_p5 = pnand %p5173_p4, %p5161_p11  ;;  %p5181_p12 = scmp.lt.s32.totalorder %s5179_s26, %s5172_s19 }
  0x1f   : > { %p5176_p6 = pneg %p5175_p5  ;;  %p5182_p9 = por %p5181_p12, %p5180_p10 }
  0x21   : > { %p5183_p7 = pnand %p5182_p9, %p5176_p6 }
  0x23   : > { %5186 = shalt.err (!%p5183_p7)
}
  0x24   : > { %s5252_s29 = smov 256   ;;  %s5253_s30 = smov 16  }
  0x25   : > { %4531 = dma.hbm_to_vmem [thread:$0]  (!%p5369_p8), %s5376_s25, 41472, %s5378_s27, %s5381_s28, %s5252_s29, %s5252_s29, %s5253_s30  }
  0x26   : > { %p300_p11 = scmp.lt.s32.totalorder %s5249_s12, 3  ;;  %p6445_p13 = scmp.ge.s32.totalorder %s5249_s12, 1 }
  0x28   : > { %p301_p0 = pnand %p6445_p13, %p300_p11 }
  0x29   : > { %s306_s15 = sand.u32 (!%p301_p0), 1, %s5241_s10   ;;  %p6446_p7 = scmp.ne.s32.totalorder (!%p301_p0), %s6443_s18, 0 }
  0x2a   : > { %304 = sbr.rel (%p301_p0) target bundleno = 1897 (0x769), region = 56  ;;  %s307_s21 = scalar_lea.sflag (!%p301_p0), [#allocation5], %s306_s15 }
  0x2b   : > { %s4521_s16 = smul.u32 (!%p301_p0), 2592, %s306_s15 }
  0x2d   : > { %s5406_s23 = scalar_lea.vmem (!%p301_p0), [#allocation4], %s4521_s16 }
  0x2f   : > { %5228 = dma.done.wait (%p6446_p7), %s307_s21, 41472  }
  0x30   : > { %5230 = vsyncadd (%p6446_p7), %s307_s21, 4294925824  ;;  %p3999_p9 = scmp.ne.s32.totalorder %s5346_s13, 0 }
  0x31   : > { %s5255_s21 = smov (!%p3999_p9), 8   ;;  %s5256_s22 = smov (!%p3999_p9), 89  }
  0x32   : > { %346 = sbr.rel (%p3999_p9) target bundleno = 670 (0x29e), region = 64  ;;  %s5257_s25 = smov (!%p3999_p9), 42  }
  0x33   : > { %s5258_s12 = smov (!%p3999_p9), 123   ;;  %s5259_s19 = smov (!%p3999_p9), 76  }
  0x34   : > { %s5260_s18 = smov (!%p3999_p9), 29   ;;  %s5261_s20 = smov (!%p3999_p9), 34  }
  0x35   : > { %s5262_s24 = smov (!%p3999_p9), 81   ;;  %s5263_s26 = smov (!%p3999_p9), 21  }
  0x36   : > { %s5264_s29 = smov (!%p3999_p9), 68   ;;  %s5265_s30 = smov (!%p3999_p9), 102  }
  0x37   : > { %v367_v0 = vld [vmem:[%s6430_s0 + $0x60] sm:$0xf]  ;;  %vm441_vm0 = vcmask 1043456   ;;  %v366_v1 = vld [vmem:[%s6430_s0 + $0x58] sm:$0xff]  ;;  %v365_v2 = vld [vmem:[%s6430_s0 + $0x50] sm:$0xff]  ;;  %vm416_vm1 = vcmask 818176  }
  0x38   : > { %4460 = vmatprep.subr.msk.mxu0 %vm441_vm0, %v367_v0  ;;  %v5254_v3 = vmov 0   ;;  %v364_v4 = vld [vmem:[%s6430_s0 + $0x48] sm:$0xff]  ;;  %v347_v5 = vld [vmem:[%s6431_s1] sm:$0xff]  ;;  %v375_v7 = vld [vmem:[%s6432_s2 + $0x38] sm:$0xff]  ;;  %vm586_vm2 = vcmask 523264   ;;  %s5266_s15 = smov 55  }
  0x39   : > { %4461 = vmatpush3.msk.msra.mxu0 %vm441_vm0, %v367_v0  ;;  %4592 = vset.pattern.permute.xlu0 %v5254_v3  ;;  %v363_v6 = vld [vmem:[%s6430_s0 + $0x40] sm:$0xff]  ;;  %v373_v8 = vld [vmem:[%s6432_s2 + $0x28] sm:$0xff]  ;;  %v362_v9 = vld [vmem:[%s6430_s0 + $0x38] sm:$0xff]  ;;  %s5267_s16 = smov 110   ;;  %vm875_vm4 = vcmask 1040384   ;;  %vm878_vm6 = vcmask 1041409  }
  0x3a   : > { %4462 = vmatprep.subr.mxu0 %v366_v1  ;;  %4593 = vset.pattern.permute.xlu1 %v5254_v3  ;;  %v374_v10 = vld [vmem:[%s6432_s2 + $0x30] sm:$0xff]  ;;  %v372_v12 = vld [vmem:[%s6432_s2 + $0x20] sm:$0xff]  ;;  %v360_v13 = vld [vmem:[%s6430_s0 + $0x28] sm:$0xff]  ;;  %vm876_vm5 = vsmask.f32 256  ;;  %vm767_vm9 = vcmask 343040  }
  0x3b   : > { %4463 = vmatpush3.msra.mxu0 %v366_v1  ;;  %4486 = vmatprep.mubr.msk.f32.mxu0 %vm416_vm1, %v347_v5  ;;  %v361_v11 = vld [vmem:[%s6430_s0 + $0x30] sm:$0xff]  ;;  %v371_v14 = vld [vmem:[%s6432_s2 + $0x18] sm:$0xff]  ;;  %v359_v15 = vld [vmem:[%s6430_s0 + $0x20] sm:$0xff]  ;;  %vm879_vm7 = vsmask.f32 1280  ;;  %vm769_vm10 = vcmask 1006592  }
  0x3c   : > { %4464 = vmatprep.subr.mxu0 %v365_v2  ;;  %413 = vperm.xlu0 %4592, %v375_v7   ;;  %v370_v16 = vld [vmem:[%s6432_s2 + $0x10] sm:$0xff]  ;;  %v358_v17 = vld [vmem:[%s6430_s0 + $0x18] sm:$0xff]  ;;  %v369_v18 = vld [vmem:[%s6432_s2 + $0x8] sm:$0xff]  ;;  %vm882_vm12 = vcmask 1042434   ;;  %vm6441_vm13 = vsmask.f32 2304 }
  0x3d   : > { %4465 = vmatpush3.msra.mxu0 %v365_v2  ;;  %403 = vperm.xlu1 %4593, %v373_v8   ;;  %v357_v19 = vld [vmem:[%s6430_s0 + $0x10] sm:$0xff]  ;;  %v368_v20 = vld [vmem:[%s6432_s2] sm:$0xff]  ;;  %v356_v21 = vld [vmem:[%s6430_s0 + $0x8] sm:$0xff]  ;;  %vm771_vm14 = vcmask 621568   ;;  %vm773_vm15 = vcmask 236544  }
  0x3e   : > { %4466 = vmatprep.subr.mxu0 %v364_v4  ;;  %v562_v22 = vld [vmem:[%s6434_s4] sm:$0xff]  ;;  %v563_v24 = vld [vmem:[%s6434_s4 + $0x8] sm:$0xff]  ;;  %v349_v26 = vld [vmem:[%s6431_s1 + $0x10] sm:$0xff] }
  0x3f   : > { %4467 = vmatpush3.msra.mxu0 %v364_v4  ;;  %v355_v23 = vld [vmem:[%s6430_s0] sm:$0xff]  ;;  %v348_v25 = vld [vmem:[%s6431_s1 + $0x8] sm:$0xff]  ;;  %v564_v27 = vld [vmem:[%s6434_s4 + $0x10] sm:$0xff] }
  0x40   : > { %4468 = vmatprep.subr.mxu0 %v363_v6  ;;  %408 = vperm.xlu0 %4592, %v374_v10   ;;  %v565_v28 = vld [vmem:[%s6434_s4 + $0x18] sm:$0xff]  ;;  %v351_v30 = vld [vmem:[%s6431_s1 + $0x20] sm:$0xff]  ;;  %v352_v31 = vld [vmem:[%s6431_s1 + $0x28] sm:$0xff] }
  0x41   : > { %4469 = vmatpush3.msra.mxu0 %v363_v6  ;;  %398 = vperm.xlu1 %4593, %v372_v12   ;;  %v350_v29 = vld [vmem:[%s6431_s1 + $0x18] sm:$0xff]  ;;  %v353_v32 = vld [vmem:[%s6431_s1 + $0x30] sm:$0xff]  ;;  %v558_v34 = vld [vmem:[%s6433_s3] sm:$0xff] }
  0x42   : > { %4470 = vmatprep.subr.mxu0 %v362_v9  ;;  %v354_v33 = vld [vmem:[%s6431_s1 + $0x38] sm:$0xff]  ;;  %4514 = vmatprep.mubr.msk.f32.mxu1 %vm586_vm2, %v558_v34  ;;  %v559_v3 = vld [vmem:[%s6433_s3 + $0x8] sm:$0xff]  ;;  %v560_v4 = vld [vmem:[%s6433_s3 + $0x10] sm:$0xff] }
  0x43   : > { %4471 = vmatpush3.msra.mxu0 %v362_v9  ;;  %v561_v5 = vld [vmem:[%s6433_s3 + $0x18] sm:$0xff]  ;;  %vm5584_vm8 = vmand %vm875_vm4, %vm876_vm5  ;;  %vm886_vm4 = vcmask 1043459   ;;  %vm887_vm5 = vsmask.f32 3328 }
  0x44   : > { %4472 = vmatprep.subr.mxu0 %v361_v11  ;;  %393 = vperm.xlu0 %4592, %v371_v14   ;;  %vm5588_vm11 = vmand %vm878_vm6, %vm879_vm7  ;;  %vm894_vm7 = vcmask 1045509   ;;  %vm895_vm6 = vsmask.f32 5376 }
  0x45   : > { %4473 = vmatpush3.msra.mxu0 %v361_v11  ;;  %388 = vperm.xlu1 %4593, %v370_v16   ;;  %vm6442_vm0 = vmor %vm5588_vm11, %vm5584_vm8 }
  0x46   : > { %4474 = vmatprep.subr.mxu0 %v360_v13 }
  0x47   : > { %4475 = vmatpush3.msra.mxu0 %v360_v13 }
  0x48   : > { %4476 = vmatprep.subr.mxu0 %v359_v15  ;;  %383 = vperm.xlu0 %4592, %v369_v18  }
  0x49   : > { %4477 = vmatpush3.msra.mxu0 %v359_v15  ;;  %378 = vperm.xlu1 %4593, %v368_v20  }
  0x4a   : > { %4478 = vmatprep.subr.mxu0 %v358_v17 }
  0x4b   : > { %4479 = vmatpush3.msra.mxu0 %v358_v17 }
  0x4c   : > { %4480 = vmatprep.subr.mxu0 %v357_v19  ;;  %568 = vperm.xlu0 %4592, %v562_v22  }
  0x4d   : > { %4481 = vmatpush3.msra.mxu0 %v357_v19  ;;  %573 = vperm.xlu1 %4593, %v563_v24  }
  0x4e   : > { %4482 = vmatprep.subr.mxu0 %v356_v21 }
  0x4f   : > { %4483 = vmatpush3.msra.mxu0 %v356_v21 }
  0x50   : > { %4484 = vmatprep.subr.mxu0 %v355_v23  ;;  %578 = vperm.xlu0 %4592, %v564_v27  }
  0x51   : > { %4485 = vmatpush3.msra.mxu0 %v355_v23  ;;  %583 = vperm.xlu1 %4593, %v565_v28  }
  0x52   : > { %4487 = vmatmul.mubr.msk.f32.vlgmr.msra.gmra.mxu0 %vm416_vm1, %v348_v25 }
  0x53   : > { %4489 = vmatprep.mubr.msk.f32.mxu0 %vm416_vm1, %v349_v26 }
  0x56   : > { %4490 = vmatmul.mubr.msk.f32.gmra.mxu0 %vm416_vm1, %v350_v29 }
  0x57   : > { %4492 = vmatprep.mubr.msk.f32.mxu0 %vm416_vm1, %v351_v30 }
  0x5a   : > { %4493 = vmatmul.mubr.msk.f32.gmra.mxu0 %vm416_vm1, %v352_v31 }
  0x5b   : > { %4495 = vmatprep.mubr.msk.f32.mxu0 %vm416_vm1, %v353_v32 }
  0x5e   : > { %4496 = vmatmul.mubr.msk.f32.gmra.mxu0 %vm416_vm1, %v354_v33  ;;  %vm749_vm1 = vcmask 662528  }
  0xb7   : > { %v414_v36 = vpop.permute.xlu0 %413 }
  0xb8   : > { %v404_v38 = vpop.permute.xlu1 %403 }
  0xbb   : > { %v409_v41 = vpop.permute.xlu0 %408 }
  0xbc   : > { %v399_v43 = vpop.permute.xlu1 %398 }
  0xbf   : > { %v394_v47 = vpop.permute.xlu0 %393 }
  0xc0   : > { %v389_v52 = vpop.permute.xlu1 %388 }
  0xc3   : > { %v384_v57 = vpop.permute.xlu0 %383 }
  0xc4   : > { %v379_v60 = vpop.permute.xlu1 %378 }
  0xc7   : > { %v569_v9 = vpop.permute.xlu0 %568 }
  0xc8   : > { %v574_v6 = vpop.permute.xlu1 %573 }
  0xcb   : > { %v579_v17 = vpop.permute.xlu0 %578 }
  0xcc   : > { %v584_v11 = vpop.permute.xlu1 %583 }
 0x112   : > { %v4488_v35 = vpop.f32.mrf.mxu0 }
 0x113   : > { %v517_v61 = vadd.f32 %v4488_v35, %v384_v57 }
 0x114   : > { %v511_v37 = vpop.f32.mrf.mxu0 }
 0x115   : > { %v512_v63 = vadd.f32 %v511_v37, %v379_v60  ;;  %v551_v1 = vmax.f32 %v517_v61, 0.0 }
 0x116   : > { %v4491_v39 = vpop.f32.mrf.mxu0 }
 0x117   : > { %v527_v55 = vadd.f32 %v4491_v39, %v394_v47  ;;  %v550_v2 = vmax.f32 %v512_v63, 0.0  ;;  %v1094_v39 = vld [vmem:[%s6436_s6] sm:$0xf] }
 0x118   : > { %v521_v40 = vpop.f32.mrf.mxu0 }
 0x119   : > { %v522_v58 = vadd.f32 %v521_v40, %v389_v52  ;;  %v553_v62 = vmax.f32 %v527_v55, 0.0 }
 0x11a   : > { %v4494_v42 = vpop.f32.mrf.mxu0 }
 0x11b   : > { %v537_v49 = vadd.f32 %v4494_v42, %v404_v38  ;;  %v552_v0 = vmax.f32 %v522_v58, 0.0  ;;  %v808_v38 = vlaneseq }
 0x11c   : > { %v531_v44 = vpop.f32.mrf.mxu0 }
 0x11d   : > { %v532_v53 = vadd.f32 %v531_v44, %v399_v43  ;;  %v555_v56 = vmax.f32 %v537_v49, 0.0  ;;  %vm1097_vm3 = vcmp.lt.s32.totalorder %v808_v38, 512 }
 0x11e   : > { %v4497_v45 = vpop.f32.mrf.mxu0  ;;  %1099 = vst.msk [vmem:[#allocation3] sm:$0xf] %vm1097_vm3, %v1094_v39  ;;  %vm5608_vm3 = vmand %vm882_vm12, %vm6441_vm13  ;;  %vm890_vm12 = vcmask 1044484  }
 0x11f   : > { %v547_v46 = vadd.f32 %v4497_v45, %v414_v36  ;;  %v554_v59 = vmax.f32 %v532_v53, 0.0  ;;  %vm5636_vm13 = vmand %vm886_vm4, %vm887_vm5 }
 0x120   : > { %v541_v48 = vpop.f32.mrf.mxu0 }
 0x121   : > { %v557_v50 = vmax.f32 %v547_v46, 0.0  ;;  %v542_v51 = vadd.f32 %v541_v48, %v409_v41 }
 0x123   : > { %v556_v54 = vmax.f32 %v542_v51, 0.0  ;;  %4498 = vmatprep.subr.mxu1 %v557_v50 }
 0x124   : > { %4499 = vmatpush3.msra.mxu1 %v557_v50 }
 0x125   : > { %4500 = vmatprep.subr.mxu1 %v556_v54 }
 0x126   : > { %4501 = vmatpush3.msra.mxu1 %v556_v54 }
 0x127   : > { %4502 = vmatprep.subr.mxu1 %v555_v56 }
 0x128   : > { %4503 = vmatpush3.msra.mxu1 %v555_v56 }
 0x129   : > { %4504 = vmatprep.subr.mxu1 %v554_v59 }
 0x12a   : > { %4505 = vmatpush3.msra.mxu1 %v554_v59 }
 0x12b   : > { %4506 = vmatprep.subr.mxu1 %v553_v62 }
 0x12c   : > { %4507 = vmatpush3.msra.mxu1 %v553_v62 }
 0x12d   : > { %4508 = vmatprep.subr.mxu1 %v552_v0 }
 0x12e   : > { %4509 = vmatpush3.msra.mxu1 %v552_v0 }
 0x12f   : > { %4510 = vmatprep.subr.mxu1 %v551_v1 }
 0x130   : > { %4511 = vmatpush3.msra.mxu1 %v551_v1 }
 0x131   : > { %4512 = vmatprep.subr.mxu1 %v550_v2 }
 0x132   : > { %4513 = vmatpush3.msra.mxu1 %v550_v2 }
 0x133   : > { %4515 = vmatmul.mubr.msk.f32.vlgmr.msra.gmra.mxu1 %vm586_vm2, %v559_v3 }
 0x134   : > { %4517 = vmatprep.mubr.msk.f32.mxu1 %vm586_vm2, %v560_v4 }
 0x137   : > { %4518 = vmatmul.mubr.msk.f32.gmra.mxu1 %vm586_vm2, %v561_v5 }
 0x1f3   : > { %v4516_v7 = vpop.f32.mrf.mxu1 }
 0x1f4   : > { %v671_v8 = vadd.f32 %v4516_v7, %v574_v6  ;;  %v5270_v7 = vmov 1966171168  }
 0x1f5   : > { %v665_v10 = vpop.f32.mrf.mxu1 }
 0x1f6   : > { %v5536_v12 = vmax.f32 %v671_v8, 0.0  ;;  %v666_v23 = vadd.f32 %v665_v10, %v569_v9  ;;  %v806_v8 = vunpack.c.l.s4 %v5270_v7 }
 0x1f7   : > { %v4519_v13 = vpop.f32.mrf.mxu1 }
 0x1f8   : > { %v681_v14 = vadd.f32 %v4519_v13, %v584_v11  ;;  %v721_v18 = vrot.slane %v5536_v12, 1  ;;  %v725_v25 = vrot.slane %v5536_v12, 2  ;;  %v729_v29 = vrot.slane %v5536_v12, 3 }
 0x1f9   : > { %v675_v15 = vpop.f32.mrf.mxu1  ;;  %v5551_v31 = vmax.f32 %v666_v23, 0.0  ;;  %v733_v33 = vrot.slane %v5536_v12, 4  ;;  %v737_v36 = vrot.slane %v5536_v12, 5  ;;  %v741_v59 = vrot.slane %v5536_v12, 6 }
 0x1fa   : > { %v5538_v16 = vmax.f32 %v681_v14, 0.0  ;;  %v676_v19 = vadd.f32 %v675_v15, %v579_v17  ;;  %v745_v1 = vrot.slane %v5536_v12, 7 }
 0x1fb   : > { %v693_v41 = vrot.slane %v5551_v31, 2  ;;  %v689_v44 = vrot.slane %v5551_v31, 1  ;;  %v705_v47 = vrot.slane %v5551_v31, 5  ;;  %v701_v50 = vrot.slane %v5551_v31, 4 }
 0x1fc   : > { %v4594_v20 = vpack.i.bf16 %v5538_v16, %v5536_v12  ;;  %v948_v21 = vrot.slane %v5538_v16, 1  ;;  %v952_v22 = vrot.slane %v5538_v16, 2  ;;  %v956_v26 = vrot.slane %v5538_v16, 3 }
 0x1fd   : > { %v5547_v27 = vmax.f32 %v676_v19, 0.0  ;;  %v960_v30 = vrot.slane %v5538_v16, 4  ;;  %v964_v34 = vrot.slane %v5538_v16, 5  ;;  %v709_v53 = vrot.slane %v5551_v31, 6 }
 0x1fe   : > { %4595 = vrot.lane.b32.xlu1 %v4594_v20, %s5255_s21  ;;  %v4599_v24 = vpack.i.bf16 %v948_v21, %v721_v18  ;;  %v4604_v28 = vpack.i.bf16 %v952_v22, %v725_v25  ;;  %v4609_v32 = vpack.i.bf16 %v956_v26, %v729_v29  ;;  %v713_v56 = vrot.slane %v5551_v31, 7  ;;  %s5268_s21 = smov 115  }
 0x1ff   : > { %v4614_v35 = vpack.i.bf16 %v960_v30, %v733_v33  ;;  %v920_v37 = vrot.slane %v5547_v27, 2  ;;  %v4619_v40 = vpack.i.bf16 %v964_v34, %v737_v36  ;;  %v916_v42 = vrot.slane %v5547_v27, 1 }
 0x200   : > { %4600 = vrot.lane.b32.xlu0 %v4599_v24, %s5256_s22  ;;  %v932_v45 = vrot.slane %v5547_v27, 5  ;;  %v928_v48 = vrot.slane %v5547_v27, 4  ;;  %v936_v51 = vrot.slane %v5547_v27, 6  ;;  %v940_v54 = vrot.slane %v5547_v27, 7  ;;  %s5269_s22 = smov 63  }
 0x201   : > { %v4629_v43 = vpack.i.bf16 %v920_v37, %v693_v41  ;;  %v4624_v46 = vpack.i.bf16 %v916_v42, %v689_v44  ;;  %v968_v57 = vrot.slane %v5538_v16, 6  ;;  %v924_v60 = vrot.slane %v5547_v27, 3 }
 0x202   : > { %4605 = vrot.lane.b32.xlu1 %v4604_v28, %s5257_s25  ;;  %v4639_v49 = vpack.i.bf16 %v932_v45, %v705_v47  ;;  %v4634_v52 = vpack.i.bf16 %v928_v48, %v701_v50  ;;  %v4654_v55 = vpack.i.bf16 %v936_v51, %v709_v53  ;;  %v4644_v58 = vpack.i.bf16 %v940_v54, %v713_v56 }
 0x203   : > { %v4659_v61 = vpack.i.bf16 %v968_v57, %v741_v59  ;;  %v697_v62 = vrot.slane %v5551_v31, 3  ;;  %v972_v0 = vrot.slane %v5538_v16, 7  ;;  %v807_v20 = vunpack.c.0.s8 %v806_v8 }
 0x204   : > { %4610 = vrot.lane.b32.xlu0 %v4609_v32, %s5258_s12  ;;  %v809_v21 = vshrl.u32 %v808_v38, 7 }
 0x205   : > { %v4649_v63 = vpack.i.bf16 %v924_v60, %v697_v62  ;;  %v4664_v2 = vpack.i.bf16 %v972_v0, %v745_v1 }
 0x206   : > { %4615 = vrot.lane.b32.xlu1 %v4614_v35, %s5259_s19  ;;  %v5620_v33 = vsub.s32 %v807_v20, %v809_v21 }
 0x208   : > { %4620 = vrot.lane.b32.xlu0 %v4619_v40, %s5260_s18 }
 0x20a   : > { %4630 = vrot.lane.b32.xlu1 %v4629_v43, %s5261_s20 }
 0x20c   : > { %4625 = vrot.lane.b32.xlu0 %v4624_v46, %s5262_s24 }
 0x20e   : > { %4640 = vrot.lane.b32.xlu1 %v4639_v49, %s5263_s26 }
 0x210   : > { %4635 = vrot.lane.b32.xlu0 %v4634_v52, %s5264_s29 }
 0x212   : > { %4655 = vrot.lane.b32.xlu1 %v4654_v55, %s5265_s30 }
 0x214   : > { %4645 = vrot.lane.b32.xlu0 %v4644_v58, %s5266_s15 }
 0x216   : > { %4660 = vrot.lane.b32.xlu1 %v4659_v61, %s5267_s16 }
 0x218   : > { %4650 = vrot.lane.b32.xlu0 %v4649_v63, %s5268_s21 }
 0x21c   : > { %4665 = vrot.lane.b32.xlu0 %v4664_v2, %s5269_s22 }
 0x270   : > { %v5578_v3 = vpop.permute.xlu1 %4595 }
 0x271   : > { %v4598_v43 = vunpack.i.h.bf16 %v5578_v3  ;;  %v4597_v44 = vunpack.i.l.bf16 %v5578_v3 }
 0x272   : > { %v5580_v4 = vpop.permute.xlu0 %4600 }
 0x273   : > { %v4602_v16 = vunpack.i.l.bf16 %v5580_v4  ;;  %v4603_v18 = vunpack.i.h.bf16 %v5580_v4 }
 0x274   : > { %v4606_v5 = vpop.permute.xlu1 %4605 }
 0x275   : > { %v4607_v11 = vunpack.i.l.bf16 %v4606_v5  ;;  %v4608_v13 = vunpack.i.h.bf16 %v4606_v5  ;;  %v1088_v5 = vld [vmem:[#allocation2 + $0xb] sm:$0xff] }
 0x276   : > { %v4611_v6 = vpop.permute.xlu0 %4610 }
 0x277   : > { %v4612_v19 = vunpack.i.l.bf16 %v4611_v6  ;;  %v768_v23 = vsel %vm767_vm9, %v4602_v16, %v4607_v11  ;;  %v4613_v24 = vunpack.i.h.bf16 %v4611_v6  ;;  %v985_v26 = vsel %vm767_vm9, %v4603_v18, %v4608_v13  ;;  %vm5629_vm9 = vmor %vm5608_vm3, %vm6442_vm0 }
 0x278   : > { %v5582_v9 = vpop.permute.xlu1 %4615  ;;  %vm891_vm0 = vsmask.f32 4352  ;;  %vm889_vm4 = vmor %vm5636_vm13, %vm5629_vm9  ;;  %vm6464_vm3 = vcmask 449536   ;;  %vm6470_vm13 = vcmask 277504   ;;  %vm6471_vm9 = vcmask 728064  }
 0x279   : > { %v4617_v14 = vunpack.i.l.bf16 %v5582_v9  ;;  %v4618_v17 = vunpack.i.h.bf16 %v5582_v9  ;;  %v770_v32 = vsel %vm769_vm10, %v768_v23, %v4612_v19  ;;  %v986_v37 = vsel %vm769_vm10, %v985_v26, %v4613_v24  ;;  %vm5664_vm5 = vmand %vm890_vm12, %vm891_vm0 }
 0x27a   : > { %v4621_v15 = vpop.permute.xlu0 %4620  ;;  %vm6459_vm0 = vcmask 277504   ;;  %vm6460_vm12 = vcmask 171008   ;;  %vm5684_vm10 = vmor %vm5664_vm5, %vm889_vm4  ;;  %vm6475_vm4 = vcmask 941056   ;;  %vm6476_vm5 = vcmask 556032  }
 0x27b   : > { %v772_v28 = vsel %vm771_vm14, %v4612_v19, %v4617_v14  ;;  %v987_v30 = vsel %vm771_vm14, %v4613_v24, %v4618_v17  ;;  %v4623_v34 = vunpack.i.h.bf16 %v4621_v15  ;;  %v4622_v39 = vunpack.i.l.bf16 %v4621_v15  ;;  %vm6461_vm2 = vmmov %vm6460_vm12 }
 0x27c   : > { %v5597_v22 = vpop.permute.xlu1 %4630  ;;  %v4016_v38 = vpack.c.bf16 %v772_v28, %v770_v32  ;;  %v4021_v41 = vpack.c.bf16 %v987_v30, %v986_v37  ;;  %vm6465_vm14 = vcmask 64512  }
 0x27d   : > { %v5645_v45 = vsel %vm773_vm15, %v4618_v17, %v4623_v34  ;;  %v5658_v51 = vsel %vm773_vm15, %v4617_v14, %v4622_v39  ;;  %v4633_v52 = vunpack.i.h.bf16 %v5597_v22  ;;  %v4632_v53 = vunpack.i.l.bf16 %v5597_v22 }
 0x27e   : > { %v5616_v29 = vpop.permute.xlu0 %4625  ;;  %v5655_v50 = vrot.slane %v4016_v38, %v5620_v33  ;;  %v5669_v55 = vrot.slane %v4021_v41, %v5620_v33  ;;  %vm775_vm15 = vcmask 900096  }
 0x27f   : > { %v4628_v46 = vunpack.i.h.bf16 %v5616_v29  ;;  %v4627_v56 = vunpack.i.l.bf16 %v5616_v29 }
 0x280   : > { %v4641_v35 = vpop.permute.xlu1 %4640 }
 0x281   : > { %v4643_v57 = vunpack.i.h.bf16 %v4641_v35  ;;  %v4642_v58 = vunpack.i.l.bf16 %v4641_v35  ;;  %v976_v0 = vsel %vm749_vm1, %v5547_v27, %v4628_v46  ;;  %v977_v1 = vsel %vm6459_vm0, %v4628_v46, %v4633_v52  ;;  %vm6466_vm0 = vmmov %vm6464_vm3 }
 0x282   : > { %v5640_v42 = vpop.permute.xlu0 %4635  ;;  %v750_v13 = vsel %vm749_vm1, %v5551_v31, %v4627_v56  ;;  %v752_v14 = vsel %vm6470_vm13, %v4627_v56, %v4632_v53 }
 0x283   : > { %v4638_v47 = vunpack.i.h.bf16 %v5640_v42  ;;  %v4637_v48 = vunpack.i.l.bf16 %v5640_v42 }
 0x284   : > { %v4656_v49 = vpop.permute.xlu1 %4655 }
 0x285   : > { %v4658_v60 = vunpack.i.h.bf16 %v4656_v49  ;;  %v4657_v61 = vunpack.i.l.bf16 %v4656_v49  ;;  %v980_v2 = vsel %vm6460_vm12, %v4638_v47, %v4643_v57  ;;  %v758_v3 = vsel %vm6461_vm2, %v4637_v48, %v4642_v58  ;;  %vm6467_vm12 = vmmov %vm6465_vm14 }
 0x286   : > { %v4646_v59 = vpop.permute.xlu0 %4645  ;;  %vm5694_vm2 = vmand %vm894_vm7, %vm895_vm6  ;;  %vm6473_vm6 = vcmask 834560  }
 0x287   : > { %v4648_v62 = vunpack.i.h.bf16 %v4646_v59  ;;  %v4647_v63 = vunpack.i.l.bf16 %v4646_v59  ;;  %v760_v24 = vsel %vm6473_vm6, %v758_v3, %v4657_v61  ;;  %vm6474_vm7 = vmmov %vm6473_vm6 }
 0x288   : > { %v4661_v9 = vpop.permute.xlu1 %4660  ;;  %v981_v31 = vsel %vm6474_vm7, %v980_v2, %v4658_v60  ;;  %vm897_vm1 = vmor %vm5694_vm2, %vm5684_vm10  ;;  %vm6483_vm7 = vsmask.f32 7424  ;;  %vm6487_vm10 = vcmask 515072  }
 0x289   : > { %v982_v6 = vsel %vm6464_vm3, %v4658_v60, %v4648_v62  ;;  %v983_v27 = vsel %vm6465_vm14, %v4648_v62, %v4598_v43  ;;  %v762_v7 = vsel %vm6466_vm0, %v4657_v61, %v4647_v63  ;;  %v764_v8 = vsel %vm6467_vm12, %v4647_v63, %v4597_v44  ;;  %vm6472_vm14 = vmmov %vm6471_vm9  ;;  %v906_v63 = vld [vmem:[#allocation2] sm:$0xff] }
 0x28a   : > { %v984_v15 = vsel %vm6471_vm9, %v983_v27, %v4603_v18  ;;  %v766_v17 = vsel %vm6472_vm14, %v764_v8, %v4602_v16  ;;  %v4651_v19 = vpop.permute.xlu0 %4650  ;;  %vm909_vm3 = vcmask 124930   ;;  %v4663_v25 = vunpack.i.h.bf16 %v4661_v9  ;;  %vm6479_vm9 = vmmov %vm6475_vm4  ;;  %v912_v8 = vld [vmem:[#allocation2 + $0x8] sm:$0x7] }
 0x28b   : > { %v4020_v20 = vpack.c.bf16 %v984_v15, %v982_v6  ;;  %v4015_v21 = vpack.c.bf16 %v766_v17, %v762_v7  ;;  %v4653_v22 = vunpack.i.h.bf16 %v4651_v19  ;;  %v4652_v23 = vunpack.i.l.bf16 %v4651_v19  ;;  %vm6480_vm14 = vmmov %vm6476_vm5 }
 0x28c   : > { %v4662_v26 = vunpack.i.l.bf16 %v4661_v9  ;;  %vm6477_vm0 = vsmask.f32 6400  ;;  %vm6478_vm12 = vcmask 1046534   ;;  %v989_v46 = vsel %vm775_vm15, %v5645_v45, %v4663_v25  ;;  %vm6488_vm2 = vmmov %vm6487_vm10  ;;  %v1091_v9 = vld [vmem:[#allocation2 + $0x13] sm:$0x7] }
 0x28d   : > { %v1037_v4 = vrot.slane %v4020_v20, %v5620_v33  ;;  %v825_v16 = vrot.slane %v4015_v21, %v5620_v33  ;;  %v754_v18 = vsel %vm6475_vm4, %v752_v14, %v4652_v23  ;;  %v756_v28 = vsel %vm6476_vm5, %v4652_v23, %v4637_v48  ;;  %vm900_vm13 = vmand %vm6478_vm12, %vm6477_vm0 }
 0x28e   : > { %v4013_v29 = vpack.c.bf16 %v754_v18, %v750_v13  ;;  %v4014_v30 = vpack.c.bf16 %v760_v24, %v756_v28  ;;  %v978_v32 = vsel %vm6479_vm9, %v977_v1, %v4653_v22  ;;  %v979_v34 = vsel %vm6480_vm14, %v4653_v22, %v4638_v47  ;;  %v4666_v35 = vpop.permute.xlu0 %4665  ;;  %vm5730_vm6 = vmor %vm900_vm13, %vm897_vm1 }
 0x28f   : > { %v1046_v36 = vcombine.low %v1037_v4, %v5669_v55  ;;  %v834_v37 = vcombine.low %v825_v16, %v5655_v50  ;;  %v4018_v38 = vpack.c.bf16 %v978_v32, %v976_v0  ;;  %v4019_v39 = vpack.c.bf16 %v981_v31, %v979_v34  ;;  %vm6490_vm12 = vmor %vm5588_vm11, %vm5584_vm8 }
 0x290   : > { %v811_v40 = vrot.slane %v4013_v29, %v5620_v33  ;;  %v818_v41 = vrot.slane %v4014_v30, %v5620_v33  ;;  %v4668_v43 = vunpack.i.h.bf16 %v4666_v35  ;;  %v4667_v44 = vunpack.i.l.bf16 %v4666_v35 }
 0x291   : > { %v776_v47 = vsel %vm775_vm15, %v5658_v51, %v4662_v26  ;;  %v1023_v48 = vrot.slane %v4018_v38, %v5620_v33  ;;  %v1030_v49 = vrot.slane %v4019_v39, %v5620_v33  ;;  %vm6484_vm4 = vcmask 1047559  }
 0x292   : > { %vm5742_vm5 = vmand %vm6484_vm4, %vm6483_vm7  ;;  %v833_v52 = vcombine.low %v811_v40, %v818_v41  ;;  %v990_v53 = vsel %vm6487_vm10, %v4663_v25, %v4668_v43  ;;  %v1001_v54 = vpack.c.bf16 %v4668_v43, %v4668_v43  ;;  %v778_v55 = vsel %vm6488_vm2, %v4662_v26, %v4667_v44 }
 0x293   : > { %v1045_v45 = vcombine.low %v1023_v48, %v1030_v49  ;;  %v4022_v56 = vpack.c.bf16 %v990_v53, %v989_v46  ;;  %v789_v57 = vpack.c.bf16 %v4667_v44, %v4667_v44  ;;  %v4017_v51 = vpack.c.bf16 %v778_v55, %v776_v47  ;;  %vm905_vm15 = vmor %vm5742_vm5, %vm5730_vm6 }
 0x294   : > { %v1060_v58 = vrot.slane %v1046_v36, %v5620_v33  ;;  %v848_v59 = vrot.slane %v834_v37, %v5620_v33  ;;  %v841_v60 = vrot.slane %v833_v52, %v5620_v33  ;;  %v1076_v61 = vrot.slane %v1001_v54, %v5620_v33 }
 0x295   : > { %v1053_v62 = vrot.slane %v1045_v45, %v5620_v33  ;;  %vm6489_vm1 = vsmask.f32 2304  ;;  %v1069_v0 = vrot.slane %v4022_v56, %v5620_v33  ;;  %v857_v1 = vrot.slane %v4017_v51, %v5620_v33 }
 0x296   : > { %vm910_vm0 = vmand %vm909_vm3, %vm6489_vm1  ;;  %v864_v2 = vrot.slane %v789_v57, %v5620_v33  ;;  %v849_v3 = vcombine.low %v841_v60, %v848_v59 }
 0x297   : > { %v1061_v6 = vcombine.low %v1053_v62, %v1060_v58  ;;  %v1077_v27 = vcombine.low %v1069_v0, %v1076_v61  ;;  %vm911_vm13 = vmor %vm910_vm0, %vm6490_vm12 }
 0x298   : > { %v865_v7 = vcombine.low %v857_v1, %v864_v2  ;;  %v907_v11 = vsel %vm905_vm15, %v849_v3, %v906_v63 }
 0x299   : > { %v1084_v13 = vrot.slane %v1077_v27, %v5620_v33  ;;  %908 = vst [vmem:[#allocation2] sm:$0xff] %v907_v11  ;;  %v1089_v10 = vsel %vm905_vm15, %v1061_v6, %v1088_v5 }
 0x29a   : > { %v872_v14 = vrot.slane %v865_v7, %v5620_v33  ;;  %1090 = vst [vmem:[#allocation2 + $0xb] sm:$0xff] %v1089_v10 }
 0x29b   : > { %v1092_v12 = vsel %vm911_vm13, %v1084_v13, %v1091_v9 }
 0x29c   : > { %v913_v15 = vsel %vm911_vm13, %v872_v14, %v912_v8  ;;  %1093 = vst [vmem:[#allocation2 + $0x13] sm:$0x7] %v1092_v12 }
 0x29d   : > { %914 = vst [vmem:[#allocation2 + $0x8] sm:$0x7] %v913_v15 }
 0x29e PF: > { %v4669_v33 = vld [vmem:[%s5406_s23 + $0xe4] ss:$16 sps:$4 sm:$0xff]   ;;  %v4673_v19 = vld [vmem:[%s5406_s23 + $0xe0] ss:$16 sps:$4 sm:$0xff]   ;;  %p1102_p8 = scmp.eq.s32.totalorder %s5346_s13, 1  ;;  %v1445_v51 = vlaneseq  ;;  %v5272_v58 = vmov 0  }
 0x29f   : > { %v4671_v17 = vld [vmem:[%s5406_s23 + $0x2e4] ss:$16 sps:$4 sm:$0xff]   ;;  %3147 = vmatprep.subr.bf16.mxu0 %v4669_v33  ;;  %v4674_v20 = vld [vmem:[%s5406_s23 + $0x2e0] ss:$16 sps:$4 sm:$0xff]   ;;  %v5271_v56 = vmov 1966171168  }
 0x2a0   : > { %3188 = vmatprep.subr.bf16.mxu1 %v4671_v17  ;;  %v4675_v21 = vld [vmem:[%s5406_s23 + $0xc4] ss:$16 sps:$4 sm:$0xff]   ;;  %3148 = vmatpush1.bf16.msra.mxu0 %v4673_v19  ;;  %v4679_v23 = vld [vmem:[%s5406_s23 + $0xc0] ss:$16 sps:$4 sm:$0xff]   ;;  %s1106_s25 = scalar_select %p1102_p8, 1, 0  ;;  %v1443_v57 = vunpack.c.l.s4 %v5271_v56 }
 0x2a1   : > { %3189 = vmatpush1.bf16.msra.mxu1 %v4674_v20  ;;  %v4677_v22 = vld [vmem:[%s5406_s23 + $0x2c4] ss:$16 sps:$4 sm:$0xff]   ;;  %3149 = vmatprep.subr.bf16.mxu0 %v4675_v21  ;;  %v4680_v24 = vld [vmem:[%s5406_s23 + $0x2c0] ss:$16 sps:$4 sm:$0xff]   ;;  %v5826_v2 = vshrl.u32 %v1445_v51, 7  ;;  %vm3143_vm3 = vcmask 130048  }
 0x2a2   : > { %3190 = vmatprep.subr.bf16.mxu1 %v4677_v22  ;;  %v4681_v31 = vld [vmem:[%s5406_s23 + $0xa4] ss:$16 sps:$4 sm:$0xff]   ;;  %v4685_v26 = vld [vmem:[%s5406_s23 + $0xa0] ss:$16 sps:$4 sm:$0xff]   ;;  %v1107_v50 = vstv %s1106_s25  ;;  %v1444_v1 = vunpack.c.0.s8 %v1443_v57  ;;  %vm3671_vm9 = vcmp.lt.s32.totalorder %v1445_v51, 512  ;;  %p4349_p1 = scmp.ne.s32.totalorder %s5346_s13, 1 }
 0x2a3   : > { %v4683_v25 = vld [vmem:[%s5406_s23 + $0x2a4] ss:$16 sps:$4 sm:$0xff]   ;;  %v4686_v4 = vld [vmem:[%s5406_s23 + $0x2a0] ss:$16 sps:$4 sm:$0xff]   ;;  %vm1108_vm8 = vcmp.eq.s32.totalorder %v1107_v50, 1  ;;  %s5273_s27 = smov (!%p4349_p1), 80  }
 0x2a4   : > { %3150 = vmatpush1.bf16.msra.mxu0 %v4679_v23  ;;  %v4687_v16 = vld [vmem:[%s5406_s23 + $0x84] ss:$16 sps:$4 sm:$0xff]   ;;  %v4691_v28 = vld [vmem:[%s5406_s23 + $0x80] ss:$16 sps:$4 sm:$0xff]   ;;  %v1109_v59 = vsel %vm1108_vm8, 1, %v5272_v58  ;;  %v5837_v8 = vsub.s32 %v1444_v1, %v5826_v2  ;;  %s5274_s28 = smov (!%p4349_p1), 112  }
 0x2a5   : > { %3191 = vmatpush1.bf16.msra.mxu1 %v4680_v24  ;;  %3151 = vmatprep.subr.bf16.mxu0 %v4681_v31  ;;  %v4689_v18 = vld [vmem:[%s5406_s23 + $0x284] ss:$16 sps:$4 sm:$0xff]   ;;  %v4692_v29 = vld [vmem:[%s5406_s23 + $0x280] ss:$16 sps:$4 sm:$0xff]   ;;  %v1110_v0 = vpack.c.b16 %v1109_v59, %v1109_v59  ;;  %s5275_s19 = smov (!%p4349_p1), 96  }
 0x2a6   : > { %3192 = vmatprep.subr.bf16.mxu1 %v4683_v25  ;;  %v4693_v30 = vld [vmem:[%s5406_s23 + $0x64] ss:$16 sps:$4 sm:$0xff]   ;;  %v4697_v34 = vld [vmem:[%s5406_s23 + $0x60] ss:$16 sps:$4 sm:$0xff]  }
 0x2a7   : > { %v4695_v32 = vld [vmem:[%s5406_s23 + $0x264] ss:$16 sps:$4 sm:$0xff]   ;;  %v4698_v35 = vld [vmem:[%s5406_s23 + $0x260] ss:$16 sps:$4 sm:$0xff]   ;;  %vm5832_vm11 = vcmp.ne.s16.totalorder %v1110_v0, 0 }
 0x2a8   : > { %3152 = vmatpush1.bf16.msra.mxu0 %v4685_v26  ;;  %v4699_v36 = vld [vmem:[%s5406_s23 + $0x44] ss:$16 sps:$4 sm:$0xff]   ;;  %v4703_v38 = vld [vmem:[%s5406_s23 + $0x40] ss:$16 sps:$4 sm:$0xff]  }
 0x2a9   : > { %3193 = vmatpush1.bf16.msra.mxu1 %v4686_v4  ;;  %3153 = vmatprep.subr.bf16.mxu0 %v4687_v16  ;;  %v4701_v37 = vld [vmem:[%s5406_s23 + $0x244] ss:$16 sps:$4 sm:$0xff]   ;;  %v4704_v39 = vld [vmem:[%s5406_s23 + $0x240] ss:$16 sps:$4 sm:$0xff]  }
 0x2aa   : > { %3194 = vmatprep.subr.bf16.mxu1 %v4689_v18  ;;  %v4705_v40 = vld [vmem:[%s5406_s23 + $0x24] ss:$16 sps:$4 sm:$0xff]   ;;  %v4709_v42 = vld [vmem:[%s5406_s23 + $0x20] ss:$16 sps:$4 sm:$0xff]  }
 0x2ab   : > { %v4707_v41 = vld [vmem:[%s5406_s23 + $0x224] ss:$16 sps:$4 sm:$0xff]   ;;  %v4710_v43 = vld [vmem:[%s5406_s23 + $0x220] ss:$16 sps:$4 sm:$0xff]  }
 0x2ac   : > { %3154 = vmatpush1.bf16.msra.mxu0 %v4691_v28  ;;  %v4711_v44 = vld [vmem:[%s5406_s23 + $0x4] ss:$16 sps:$4 sm:$0xff]   ;;  %v4715_v47 = vld [vmem:[%s5406_s23] ss:$16 sps:$4 sm:$0xff]  }
 0x2ad   : > { %3195 = vmatpush1.bf16.msra.mxu1 %v4692_v29  ;;  %3155 = vmatprep.subr.bf16.mxu0 %v4693_v30  ;;  %v4713_v46 = vld [vmem:[%s5406_s23 + $0x204] ss:$16 sps:$4 sm:$0xff]   ;;  %v4716_v48 = vld [vmem:[%s5406_s23 + $0x200] ss:$16 sps:$4 sm:$0xff]  }
 0x2ae   : > { %3196 = vmatprep.subr.bf16.mxu1 %v4695_v32  ;;  %v4717_v49 = vld [vmem:[%s5406_s23 + $0x1e4] ss:$16 sps:$4 sm:$0xff]   ;;  %v4721_v53 = vld [vmem:[%s5406_s23 + $0x1e0] ss:$16 sps:$4 sm:$0xff]  }
 0x2af   : > { %v4719_v52 = vld [vmem:[%s5406_s23 + $0x3e4] ss:$16 sps:$4 sm:$0xff]   ;;  %v4722_v54 = vld [vmem:[%s5406_s23 + $0x3e0] ss:$16 sps:$4 sm:$0xff]  }
 0x2b0   : > { %3156 = vmatpush1.bf16.msra.mxu0 %v4697_v34  ;;  %v4723_v55 = vld [vmem:[%s5406_s23 + $0x1c4] ss:$16 sps:$4 sm:$0xff]   ;;  %v4727_v60 = vld [vmem:[%s5406_s23 + $0x1c0] ss:$16 sps:$4 sm:$0xff]  }
 0x2b1   : > { %3197 = vmatpush1.bf16.msra.mxu1 %v4698_v35  ;;  %3157 = vmatprep.subr.bf16.mxu0 %v4699_v36  ;;  %v4725_v45 = vld [vmem:[%s5406_s23 + $0x3c4] ss:$16 sps:$4 sm:$0xff]   ;;  %v4728_v61 = vld [vmem:[%s5406_s23 + $0x3c0] ss:$16 sps:$4 sm:$0xff]  }
 0x2b2   : > { %3198 = vmatprep.subr.bf16.mxu1 %v4701_v37  ;;  %v4729_v62 = vld [vmem:[%s5406_s23 + $0x1a4] ss:$16 sps:$4 sm:$0xff]   ;;  %v4733_v3 = vld [vmem:[%s5406_s23 + $0x1a0] ss:$16 sps:$4 sm:$0xff]  }
 0x2b3   : > { %v4731_v63 = vld [vmem:[%s5406_s23 + $0x3a4] ss:$16 sps:$4 sm:$0xff]   ;;  %v4734_v5 = vld [vmem:[%s5406_s23 + $0x3a0] ss:$16 sps:$4 sm:$0xff]  }
 0x2b4   : > { %3158 = vmatpush1.bf16.msra.mxu0 %v4703_v38  ;;  %v4735_v6 = vld [vmem:[%s5406_s23 + $0x184] ss:$16 sps:$4 sm:$0xff]   ;;  %v4739_v11 = vld [vmem:[%s5406_s23 + $0x180] ss:$16 sps:$4 sm:$0xff]  }
 0x2b5   : > { %3199 = vmatpush1.bf16.msra.mxu1 %v4704_v39  ;;  %3159 = vmatprep.subr.bf16.mxu0 %v4705_v40  ;;  %v4737_v27 = vld [vmem:[%s5406_s23 + $0x384] ss:$16 sps:$4 sm:$0xff]   ;;  %v4740_v13 = vld [vmem:[%s5406_s23 + $0x380] ss:$16 sps:$4 sm:$0xff]  }
 0x2b6   : > { %3200 = vmatprep.subr.bf16.mxu1 %v4707_v41  ;;  %v1100_v9 = vld [vmem:[#allocation2] sm:$0xff]  ;;  %v1104_v14 = vld [vmem:[#allocation2 + $0xb] sm:$0xff] }
 0x2b7   : > { %v4741_v10 = vld [vmem:[%s5406_s23 + $0x164] ss:$16 sps:$4 sm:$0xff]   ;;  %v1112_v12 = vsel %vm5832_vm11, %v1104_v14, %v1100_v9  ;;  %v4745_v17 = vld [vmem:[%s5406_s23 + $0x160] ss:$16 sps:$4 sm:$0xff]  }
 0x2b8   : > { %3160 = vmatpush1.bf16.msra.mxu0 %v4709_v42  ;;  %v4743_v15 = vld [vmem:[%s5406_s23 + $0x364] ss:$16 sps:$4 sm:$0xff]   ;;  %v1448_v33 = vrot.slane %v1112_v12, %v5837_v8  ;;  %v4746_v19 = vld [vmem:[%s5406_s23 + $0x360] ss:$16 sps:$4 sm:$0xff]   ;;  %v1441_v24 = vcombine.high %v1112_v12, %v1112_v12 }
 0x2b9   : > { %3201 = vmatpush1.bf16.msra.mxu1 %v4710_v43  ;;  %3161 = vmatprep.subr.bf16.mxu0 %v4711_v44  ;;  %v4747_v21 = vld [vmem:[%s5406_s23 + $0x144] ss:$16 sps:$4 sm:$0xff]   ;;  %v4751_v31 = vld [vmem:[%s5406_s23 + $0x140] ss:$16 sps:$4 sm:$0xff]  }
 0x2ba   : > { %3202 = vmatprep.subr.bf16.mxu1 %v4713_v46  ;;  %v1456_v20 = vcombine.high %v1448_v33, %v1448_v33  ;;  %v4749_v22 = vld [vmem:[%s5406_s23 + $0x344] ss:$16 sps:$4 sm:$0xff]   ;;  %v4752_v25 = vld [vmem:[%s5406_s23 + $0x340] ss:$16 sps:$4 sm:$0xff]   ;;  %v5864_v18 = vrot.slane %v1441_v24, %v5837_v8  ;;  %v5875_v37 = vrot.slane %v1448_v33, %v5837_v8 }
 0x2bb   : > { %v4753_v4 = vld [vmem:[%s5406_s23 + $0x124] ss:$16 sps:$4 sm:$0xff]   ;;  %v4757_v28 = vld [vmem:[%s5406_s23 + $0x120] ss:$16 sps:$4 sm:$0xff]  }
 0x2bc   : > { %3162 = vmatpush1.bf16.msra.mxu0 %v4715_v47  ;;  %v5851_v23 = vrot.slane %v1456_v20, %v5837_v8  ;;  %v4755_v16 = vld [vmem:[%s5406_s23 + $0x324] ss:$16 sps:$4 sm:$0xff]   ;;  %v4758_v29 = vld [vmem:[%s5406_s23 + $0x320] ss:$16 sps:$4 sm:$0xff]   ;;  %v1457_v34 = vcombine.high %v5864_v18, %v5864_v18  ;;  %v5884_v41 = vcombine.high %v5875_v37, %v5875_v37 }
 0x2bd   : > { %3203 = vmatpush1.bf16.msra.mxu1 %v4716_v48  ;;  %3163 = vmatprep.subr.bf16.mxu0 %v4717_v49  ;;  %v4759_v30 = vld [vmem:[%s5406_s23 + $0x104] ss:$16 sps:$4 sm:$0xff]   ;;  %v4763_v35 = vld [vmem:[%s5406_s23 + $0x100] ss:$16 sps:$4 sm:$0xff]  }
 0x2be   : > { %3204 = vmatprep.subr.bf16.mxu1 %v4719_v52  ;;  %3179 = vmatprep.mubr.bf16.mxu0 %v5851_v23  ;;  %v5858_v26 = vcombine.high %v5851_v23, %v5851_v23  ;;  %v4761_v32 = vld [vmem:[%s5406_s23 + $0x304] ss:$16 sps:$4 sm:$0xff]   ;;  %v4764_v36 = vld [vmem:[%s5406_s23 + $0x300] ss:$16 sps:$4 sm:$0xff]   ;;  %v5880_v40 = vrot.slane %v1457_v34, %v5837_v8 }
 0x2bf   : > { %v4767_v38 = vld [vmem:[%s5406_s23 + $0x4e4] ss:$16 sps:$4 sm:$0xff]   ;;  %v4765_v42 = vld [vmem:[%s5406_s23 + $0x4e0] ss:$16 sps:$4 sm:$0xff]  }
 0x2c0   : > { %3164 = vmatpush2.bf16.msra.mxu0 %v4721_v53  ;;  %3220 = vmatprep.mubr.bf16.mxu1 %v5858_v26  ;;  %v4770_v39 = vld [vmem:[%s5406_s23 + $0x6e4] ss:$16 sps:$4 sm:$0xff]   ;;  %v4768_v43 = vld [vmem:[%s5406_s23 + $0x6e0] ss:$16 sps:$4 sm:$0xff]   ;;  %v5892_v47 = vcombine.high %v5880_v40, %v5880_v40 }
 0x2c1   : > { %3205 = vmatpush2.bf16.msra.mxu1 %v4722_v54  ;;  %3165 = vmatprep.subr.bf16.mxu0 %v4723_v55  ;;  %v4773_v44 = vld [vmem:[%s5406_s23 + $0x4c4] ss:$16 sps:$4 sm:$0xff]   ;;  %v4771_v48 = vld [vmem:[%s5406_s23 + $0x4c0] ss:$16 sps:$4 sm:$0xff]  }
 0x2c2   : > { %3206 = vmatprep.subr.bf16.mxu1 %v4725_v45  ;;  %v4776_v46 = vld [vmem:[%s5406_s23 + $0x6c4] ss:$16 sps:$4 sm:$0xff]   ;;  %v4774_v49 = vld [vmem:[%s5406_s23 + $0x6c0] ss:$16 sps:$4 sm:$0xff]  }
 0x2c3   : > { %v4779_v50 = vld [vmem:[%s5406_s23 + $0x4a4] ss:$16 sps:$4 sm:$0xff]   ;;  %v4777_v53 = vld [vmem:[%s5406_s23 + $0x4a0] ss:$16 sps:$4 sm:$0xff]  }
 0x2c4   : > { %3166 = vmatpush2.bf16.msra.mxu0 %v4727_v60  ;;  %v4782_v52 = vld [vmem:[%s5406_s23 + $0x6a4] ss:$16 sps:$4 sm:$0xff]   ;;  %v4780_v54 = vld [vmem:[%s5406_s23 + $0x6a0] ss:$16 sps:$4 sm:$0xff]  }
 0x2c5   : > { %3207 = vmatpush2.bf16.msra.mxu1 %v4728_v61  ;;  %3167 = vmatprep.subr.bf16.mxu0 %v4729_v62  ;;  %v4785_v55 = vld [vmem:[%s5406_s23 + $0x484] ss:$16 sps:$4 sm:$0xff]   ;;  %v4783_v56 = vld [vmem:[%s5406_s23 + $0x480] ss:$16 sps:$4 sm:$0xff]  }
 0x2c6   : > { %3208 = vmatprep.subr.bf16.mxu1 %v4731_v63  ;;  %v4788_v45 = vld [vmem:[%s5406_s23 + $0x684] ss:$16 sps:$4 sm:$0xff]   ;;  %v4786_v57 = vld [vmem:[%s5406_s23 + $0x680] ss:$16 sps:$4 sm:$0xff]  }
 0x2c7   : > { %v4791_v59 = vld [vmem:[%s5406_s23 + $0x464] ss:$16 sps:$4 sm:$0xff]   ;;  %v4789_v61 = vld [vmem:[%s5406_s23 + $0x460] ss:$16 sps:$4 sm:$0xff]  }
 0x2c8   : > { %3168 = vmatpush2.bf16.msra.mxu0 %v4733_v3  ;;  %v4794_v60 = vld [vmem:[%s5406_s23 + $0x664] ss:$16 sps:$4 sm:$0xff]   ;;  %v4792_v62 = vld [vmem:[%s5406_s23 + $0x660] ss:$16 sps:$4 sm:$0xff]  }
 0x2c9   : > { %3209 = vmatpush2.bf16.msra.mxu1 %v4734_v5  ;;  %3169 = vmatprep.subr.bf16.mxu0 %v4735_v6  ;;  %v4797_v63 = vld [vmem:[%s5406_s23 + $0x444] ss:$16 sps:$4 sm:$0xff]   ;;  %v4795_v1 = vld [vmem:[%s5406_s23 + $0x440] ss:$16 sps:$4 sm:$0xff]  }
 0x2ca   : > { %3210 = vmatprep.subr.bf16.mxu1 %v4737_v27  ;;  %v4800_v0 = vld [vmem:[%s5406_s23 + $0x644] ss:$16 sps:$4 sm:$0xff]   ;;  %v4798_v3 = vld [vmem:[%s5406_s23 + $0x640] ss:$16 sps:$4 sm:$0xff]  }
 0x2cb   : > { %v4803_v5 = vld [vmem:[%s5406_s23 + $0x424] ss:$16 sps:$4 sm:$0xff]   ;;  %v4801_v27 = vld [vmem:[%s5406_s23 + $0x420] ss:$16 sps:$4 sm:$0xff]  }
 0x2cc   : > { %3170 = vmatpush2.bf16.msra.mxu0 %v4739_v11  ;;  %v4806_v6 = vld [vmem:[%s5406_s23 + $0x624] ss:$16 sps:$4 sm:$0xff]   ;;  %v4804_v9 = vld [vmem:[%s5406_s23 + $0x620] ss:$16 sps:$4 sm:$0xff]  }
 0x2cd   : > { %3211 = vmatpush2.bf16.msra.mxu1 %v4740_v13  ;;  %3171 = vmatprep.subr.bf16.mxu0 %v4741_v10  ;;  %v4809_v11 = vld [vmem:[%s5406_s23 + $0x404] ss:$16 sps:$4 sm:$0xff]   ;;  %v4807_v14 = vld [vmem:[%s5406_s23 + $0x400] ss:$16 sps:$4 sm:$0xff]  }
 0x2ce   : > { %3212 = vmatprep.subr.bf16.mxu1 %v4743_v15  ;;  %v4812_v13 = vld [vmem:[%s5406_s23 + $0x604] ss:$16 sps:$4 sm:$0xff]   ;;  %v4810_v10 = vld [vmem:[%s5406_s23 + $0x600] ss:$16 sps:$4 sm:$0xff]  }
 0x2cf   : > { %v4815_v12 = vld [vmem:[%s5406_s23 + $0x5e4] ss:$16 sps:$4 sm:$0xff]   ;;  %v4813_v33 = vld [vmem:[%s5406_s23 + $0x5e0] ss:$16 sps:$4 sm:$0xff]  }
 0x2d0   : > { %3172 = vmatpush2.bf16.msra.mxu0 %v4745_v17  ;;  %v4818_v15 = vld [vmem:[%s5406_s23 + $0x7e4] ss:$16 sps:$4 sm:$0xff]   ;;  %v4816_v17 = vld [vmem:[%s5406_s23 + $0x7e0] ss:$16 sps:$4 sm:$0xff]  }
 0x2d1   : > { %3213 = vmatpush2.bf16.msra.mxu1 %v4746_v19  ;;  %3173 = vmatprep.subr.bf16.mxu0 %v4747_v21  ;;  %v4821_v19 = vld [vmem:[%s5406_s23 + $0x5c4] ss:$16 sps:$4 sm:$0xff]   ;;  %v4819_v21 = vld [vmem:[%s5406_s23 + $0x5c0] ss:$16 sps:$4 sm:$0xff]  }
 0x2d2   : > { %3214 = vmatprep.subr.bf16.mxu1 %v4749_v22  ;;  %v4824_v20 = vld [vmem:[%s5406_s23 + $0x7c4] ss:$16 sps:$4 sm:$0xff]   ;;  %v4822_v22 = vld [vmem:[%s5406_s23 + $0x7c0] ss:$16 sps:$4 sm:$0xff]  }
 0x2d3   : > { %v4827_v24 = vld [vmem:[%s5406_s23 + $0x5a4] ss:$16 sps:$4 sm:$0xff]  }
 0x2d4   : > { %3174 = vmatpush2.bf16.msra.mxu0 %v4751_v31  ;;  %v4830_v31 = vld [vmem:[%s5406_s23 + $0x7a4] ss:$16 sps:$4 sm:$0xff]  }
 0x2d5   : > { %3215 = vmatpush2.bf16.msra.mxu1 %v4752_v25  ;;  %3175 = vmatprep.subr.bf16.mxu0 %v4753_v4  ;;  %v4825_v25 = vld [vmem:[%s5406_s23 + $0x5a0] ss:$16 sps:$4 sm:$0xff]   ;;  %v4842_v34 = vld [vmem:[%s5406_s23 + $0x764] ss:$16 sps:$4 sm:$0xff]  }
 0x2d6   : > { %3216 = vmatprep.subr.bf16.mxu1 %v4755_v16  ;;  %v4828_v4 = vld [vmem:[%s5406_s23 + $0x7a0] ss:$16 sps:$4 sm:$0xff]   ;;  %v4833_v16 = vld [vmem:[%s5406_s23 + $0x584] ss:$16 sps:$4 sm:$0xff]  }
 0x2d7   : > { %v4866_v7 = vld [vmem:[%s5406_s23 + $0xa04] ss:$16 sps:$4 sm:$0xff]  }
 0x2d8   : > { %3176 = vmatpush2.bf16.msra.mxu0 %v4757_v28  ;;  %v4836_v28 = vld [vmem:[%s5406_s23 + $0x784] ss:$16 sps:$4 sm:$0xff]  }
 0x2d9   : > { %3217 = vmatpush2.bf16.msra.mxu1 %v4758_v29  ;;  %3177 = vmatprep.subr.bf16.mxu0 %v4759_v30  ;;  %v4831_v29 = vld [vmem:[%s5406_s23 + $0x580] ss:$16 sps:$4 sm:$0xff]  }
 0x2da   : > { %3218 = vmatprep.subr.bf16.mxu1 %v4761_v32  ;;  %v4834_v30 = vld [vmem:[%s5406_s23 + $0x780] ss:$16 sps:$4 sm:$0xff]   ;;  %v4839_v32 = vld [vmem:[%s5406_s23 + $0x564] ss:$16 sps:$4 sm:$0xff]  }
 0x2dc   : > { %3178 = vmatpush2.bf16.msra.mxu0 %v4763_v35  ;;  %v4837_v35 = vld [vmem:[%s5406_s23 + $0x560] ss:$16 sps:$4 sm:$0xff]  }
 0x2dd   : > { %3219 = vmatpush2.bf16.msra.mxu1 %v4764_v36  ;;  %3229 = vmatprep.subr.bf16.mxu0 %v4767_v38  ;;  %v4840_v36 = vld [vmem:[%s5406_s23 + $0x760] ss:$16 sps:$4 sm:$0xff]   ;;  %v4845_v38 = vld [vmem:[%s5406_s23 + $0x544] ss:$16 sps:$4 sm:$0xff]  }
 0x2de   : > { %3270 = vmatprep.subr.bf16.mxu1 %v4770_v39  ;;  %v4848_v39 = vld [vmem:[%s5406_s23 + $0x744] ss:$16 sps:$4 sm:$0xff]  }
 0x2df   : > { %3180 = vmatmul.mubr.bf16.vlgmr.msra.gmra.mxu0 %v5875_v37 }
 0x2e0   : > { %3221 = vmatmul.mubr.bf16.vlgmr.msra.gmra.mxu1 %v5884_v41  ;;  %3230 = vmatpush1.bf16.msra.mxu0 %v4765_v42  ;;  %v4843_v42 = vld [vmem:[%s5406_s23 + $0x540] ss:$16 sps:$4 sm:$0xff]  }
 0x2e1   : > { %3271 = vmatpush1.bf16.msra.mxu1 %v4768_v43  ;;  %3231 = vmatprep.subr.bf16.mxu0 %v4773_v44  ;;  %v4846_v43 = vld [vmem:[%s5406_s23 + $0x740] ss:$16 sps:$4 sm:$0xff]   ;;  %v4851_v44 = vld [vmem:[%s5406_s23 + $0x524] ss:$16 sps:$4 sm:$0xff]  }
 0x2e2   : > { %3272 = vmatprep.subr.bf16.mxu1 %v4776_v46  ;;  %3261 = vmatprep.mubr.bf16.mxu0 %v5880_v40  ;;  %v4854_v46 = vld [vmem:[%s5406_s23 + $0x724] ss:$16 sps:$4 sm:$0xff]  }
 0x2e3   : > { %3302 = vmatprep.mubr.bf16.mxu1 %v5892_v47 }
 0x2e4   : > { %3232 = vmatpush1.bf16.msra.mxu0 %v4771_v48  ;;  %v1101_v48 = vld [vmem:[#allocation2 + $0x8] sm:$0x7] }
 0x2e5   : > { %3273 = vmatpush1.bf16.msra.mxu1 %v4774_v49  ;;  %3233 = vmatprep.subr.bf16.mxu0 %v4779_v50  ;;  %v1105_v49 = vld [vmem:[#allocation2 + $0x13] sm:$0x7]  ;;  %v4849_v50 = vld [vmem:[%s5406_s23 + $0x520] ss:$16 sps:$4 sm:$0xff]  }
 0x2e6   : > { %3274 = vmatprep.subr.bf16.mxu1 %v4782_v52  ;;  %v4852_v52 = vld [vmem:[%s5406_s23 + $0x720] ss:$16 sps:$4 sm:$0xff]  }
 0x2e8   : > { %3234 = vmatpush1.bf16.msra.mxu0 %v4777_v53  ;;  %v4857_v53 = vld [vmem:[%s5406_s23 + $0x504] ss:$16 sps:$4 sm:$0xff]  }
 0x2e9   : > { %3275 = vmatpush1.bf16.msra.mxu1 %v4780_v54  ;;  %3235 = vmatprep.subr.bf16.mxu0 %v4785_v55  ;;  %v1113_v54 = vsel %vm5832_vm11, %v1105_v49, %v1101_v48  ;;  %v4860_v55 = vld [vmem:[%s5406_s23 + $0x704] ss:$16 sps:$4 sm:$0xff]   ;;  %v4918_v49 = vld [vmem:[%s5406_s23 + $0x1e8] ss:$16 sps:$4 sm:$0xff]  }
 0x2ea   : > { %3276 = vmatprep.subr.bf16.mxu1 %v4788_v45  ;;  %v4855_v45 = vld [vmem:[%s5406_s23 + $0x500] ss:$16 sps:$4 sm:$0xff]   ;;  %v4923_v48 = vld [vmem:[%s5406_s23 + $0x9a4] ss:$16 sps:$4 sm:$0xff]  }
 0x2ec   : > { %3236 = vmatpush1.bf16.msra.mxu0 %v4783_v56  ;;  %v4858_v56 = vld [vmem:[%s5406_s23 + $0x700] ss:$16 sps:$4 sm:$0xff]  }
 0x2ed   : > { %3277 = vmatpush1.bf16.msra.mxu1 %v4786_v57  ;;  %3237 = vmatprep.subr.bf16.mxu0 %v4791_v59  ;;  %v5960_v57 = vrot.slane %v5864_v18, %v5837_v8  ;;  %v1496_v59 = vrot.slane %v1113_v54, %v5837_v8  ;;  %v4864_v18 = vld [vmem:[%s5406_s23 + $0xa00] ss:$16 sps:$4 sm:$0xff]   ;;  %v4924_v54 = vld [vmem:[%s5406_s23 + $0x1c8] ss:$16 sps:$4 sm:$0xff]  }
 0x2ee   : > { %3278 = vmatprep.subr.bf16.mxu1 %v4794_v60  ;;  %v4863_v60 = vld [vmem:[%s5406_s23 + $0x8e4] ss:$16 sps:$4 sm:$0xff]  }
 0x2f0   : > { %3238 = vmatpush1.bf16.msra.mxu0 %v4789_v61  ;;  %v1497_v61 = vcombine.high %v1496_v59, %v1496_v59 }
 0x2f1   : > { %3279 = vmatpush1.bf16.msra.mxu1 %v4792_v62  ;;  %3239 = vmatprep.subr.bf16.mxu0 %v4797_v63  ;;  %v5967_v62 = vcombine.high %v5960_v57, %v5960_v57  ;;  %v4861_v63 = vld [vmem:[%s5406_s23 + $0x8e0] ss:$16 sps:$4 sm:$0xff]  }
 0x2f2   : > { %3280 = vmatprep.subr.bf16.mxu1 %v4800_v0  ;;  %v4869_v0 = vld [vmem:[%s5406_s23 + $0x8c4] ss:$16 sps:$4 sm:$0xff]  }
 0x2f4   : > { %3240 = vmatpush1.bf16.msra.mxu0 %v4795_v1  ;;  %v4872_v1 = vld [vmem:[%s5406_s23 + $0xec] ss:$16 sps:$4 sm:$0xff]  }
 0x2f5   : > { %3281 = vmatpush1.bf16.msra.mxu1 %v4798_v3  ;;  %3241 = vmatprep.subr.bf16.mxu0 %v4803_v5  ;;  %v5974_v3 = vrot.slane %v1497_v61, %v5837_v8  ;;  %v5979_v5 = vrot.slane %v1496_v59, %v5837_v8  ;;  %v4930_v59 = vld [vmem:[%s5406_s23 + $0x1a8] ss:$16 sps:$4 sm:$0xff]   ;;  %v4941_v61 = vld [vmem:[%s5406_s23 + $0x944] ss:$16 sps:$4 sm:$0xff]  }
 0x2f6   : > { %3282 = vmatprep.subr.bf16.mxu1 %v4806_v6  ;;  %v4867_v6 = vld [vmem:[%s5406_s23 + $0x8c0] ss:$16 sps:$4 sm:$0xff]  }
 0x2f8   : > { %3242 = vmatpush1.bf16.msra.mxu0 %v4801_v27  ;;  %v4875_v27 = vld [vmem:[%s5406_s23 + $0x8a4] ss:$16 sps:$4 sm:$0xff]  }
 0x2f9   : > { %3283 = vmatpush1.bf16.msra.mxu1 %v4804_v9  ;;  %3243 = vmatprep.subr.bf16.mxu0 %v4809_v11  ;;  %v4870_v9 = vld [vmem:[%s5406_s23 + $0xe8] ss:$16 sps:$4 sm:$0xff]   ;;  %v4873_v11 = vld [vmem:[%s5406_s23 + $0x8a0] ss:$16 sps:$4 sm:$0xff]  }
 0x2fa   : > { %3284 = vmatprep.subr.bf16.mxu1 %v4812_v13  ;;  %v5989_v13 = vcombine.high %v5979_v5, %v5979_v5 }
 0x2fc   : > { %3244 = vmatpush1.bf16.msra.mxu0 %v4807_v14  ;;  %v4878_v14 = vld [vmem:[%s5406_s23 + $0xcc] ss:$16 sps:$4 sm:$0xff]  }
 0x2fd   : > { %3285 = vmatpush1.bf16.msra.mxu1 %v4810_v10  ;;  %3245 = vmatprep.subr.bf16.mxu0 %v4815_v12  ;;  %v4881_v10 = vld [vmem:[%s5406_s23 + $0x884] ss:$16 sps:$4 sm:$0xff]   ;;  %v4876_v12 = vld [vmem:[%s5406_s23 + $0xc8] ss:$16 sps:$4 sm:$0xff]  }
 0x2fe   : > { %3286 = vmatprep.subr.bf16.mxu1 %v4818_v15  ;;  %v4879_v15 = vld [vmem:[%s5406_s23 + $0x880] ss:$16 sps:$4 sm:$0xff]  }
 0x300   : > { %3246 = vmatpush2.bf16.msra.mxu0 %v4813_v33  ;;  %v4884_v33 = vld [vmem:[%s5406_s23 + $0xac] ss:$16 sps:$4 sm:$0xff]  }
 0x301   : > { %3287 = vmatpush2.bf16.msra.mxu1 %v4816_v17  ;;  %3247 = vmatprep.subr.bf16.mxu0 %v4821_v19  ;;  %v4887_v17 = vld [vmem:[%s5406_s23 + $0x864] ss:$16 sps:$4 sm:$0xff]   ;;  %v4882_v19 = vld [vmem:[%s5406_s23 + $0xa8] ss:$16 sps:$4 sm:$0xff]  }
 0x302   : > { %3288 = vmatprep.subr.bf16.mxu1 %v4824_v20  ;;  %v4885_v20 = vld [vmem:[%s5406_s23 + $0x860] ss:$16 sps:$4 sm:$0xff]  }
 0x304   : > { %3248 = vmatpush2.bf16.msra.mxu0 %v4819_v21  ;;  %v4890_v21 = vld [vmem:[%s5406_s23 + $0x8c] ss:$16 sps:$4 sm:$0xff]  }
 0x305   : > { %3289 = vmatpush2.bf16.msra.mxu1 %v4822_v22  ;;  %3249 = vmatprep.subr.bf16.mxu0 %v4827_v24  ;;  %v4893_v22 = vld [vmem:[%s5406_s23 + $0x844] ss:$16 sps:$4 sm:$0xff]   ;;  %v4888_v24 = vld [vmem:[%s5406_s23 + $0x88] ss:$16 sps:$4 sm:$0xff]  }
 0x306   : > { %3290 = vmatprep.subr.bf16.mxu1 %v4830_v31  ;;  %v4891_v31 = vld [vmem:[%s5406_s23 + $0x840] ss:$16 sps:$4 sm:$0xff]  }
 0x308   : > { %3250 = vmatpush2.bf16.msra.mxu0 %v4825_v25  ;;  %v4899_v25 = vld [vmem:[%s5406_s23 + $0x824] ss:$16 sps:$4 sm:$0xff]  }
 0x309   : > { %3291 = vmatpush2.bf16.msra.mxu1 %v4828_v4  ;;  %3251 = vmatprep.subr.bf16.mxu0 %v4833_v16  ;;  %v4894_v4 = vld [vmem:[%s5406_s23 + $0x68] ss:$16 sps:$4 sm:$0xff]   ;;  %v4897_v16 = vld [vmem:[%s5406_s23 + $0x820] ss:$16 sps:$4 sm:$0xff]  }
 0x30a   : > { %3292 = vmatprep.subr.bf16.mxu1 %v4836_v28  ;;  %v4902_v28 = vld [vmem:[%s5406_s23 + $0x4c] ss:$16 sps:$4 sm:$0xff]  }
 0x30c   : > { %3252 = vmatpush2.bf16.msra.mxu0 %v4831_v29  ;;  %v4905_v29 = vld [vmem:[%s5406_s23 + $0x804] ss:$16 sps:$4 sm:$0xff]  }
 0x30d   : > { %3293 = vmatpush2.bf16.msra.mxu1 %v4834_v30  ;;  %3253 = vmatprep.subr.bf16.mxu0 %v4839_v32  ;;  %v4900_v30 = vld [vmem:[%s5406_s23 + $0x48] ss:$16 sps:$4 sm:$0xff]   ;;  %v4903_v32 = vld [vmem:[%s5406_s23 + $0x800] ss:$16 sps:$4 sm:$0xff]  }
 0x30e   : > { %3294 = vmatprep.subr.bf16.mxu1 %v4842_v34  ;;  %v4908_v34 = vld [vmem:[%s5406_s23 + $0x2c] ss:$16 sps:$4 sm:$0xff]  }
 0x310   : > { %3254 = vmatpush2.bf16.msra.mxu0 %v4837_v35  ;;  %v4911_v35 = vld [vmem:[%s5406_s23 + $0x9e4] ss:$16 sps:$4 sm:$0xff]  }
 0x311   : > { %3295 = vmatpush2.bf16.msra.mxu1 %v4840_v36  ;;  %3255 = vmatprep.subr.bf16.mxu0 %v4845_v38  ;;  %v4906_v36 = vld [vmem:[%s5406_s23 + $0x28] ss:$16 sps:$4 sm:$0xff]   ;;  %v4909_v38 = vld [vmem:[%s5406_s23 + $0x9e0] ss:$16 sps:$4 sm:$0xff]  }
 0x312   : > { %3296 = vmatprep.subr.bf16.mxu1 %v4848_v39  ;;  %v4914_v39 = vld [vmem:[%s5406_s23 + $0xc] ss:$16 sps:$4 sm:$0xff]  }
 0x314   : > { %3256 = vmatpush2.bf16.msra.mxu0 %v4843_v42  ;;  %v4917_v42 = vld [vmem:[%s5406_s23 + $0x9c4] ss:$16 sps:$4 sm:$0xff]  }
 0x315   : > { %3297 = vmatpush2.bf16.msra.mxu1 %v4846_v43  ;;  %3257 = vmatprep.subr.bf16.mxu0 %v4851_v44  ;;  %v4912_v43 = vld [vmem:[%s5406_s23 + $0x8] ss:$16 sps:$4 sm:$0xff]   ;;  %v4915_v44 = vld [vmem:[%s5406_s23 + $0x9c0] ss:$16 sps:$4 sm:$0xff]  }
 0x316   : > { %3298 = vmatprep.subr.bf16.mxu1 %v4854_v46  ;;  %v4920_v46 = vld [vmem:[%s5406_s23 + $0x1ec] ss:$16 sps:$4 sm:$0xff]  }
 0x318   : > { %3258 = vmatpush2.bf16.msra.mxu0 %v4849_v50  ;;  %v4921_v50 = vld [vmem:[%s5406_s23 + $0x9a0] ss:$16 sps:$4 sm:$0xff]  }
 0x319   : > { %3299 = vmatpush2.bf16.msra.mxu1 %v4852_v52  ;;  %3259 = vmatprep.subr.bf16.mxu0 %v4857_v53  ;;  %v4926_v52 = vld [vmem:[%s5406_s23 + $0x1cc] ss:$16 sps:$4 sm:$0xff]   ;;  %v4929_v53 = vld [vmem:[%s5406_s23 + $0x984] ss:$16 sps:$4 sm:$0xff]  }
 0x31a   : > { %3300 = vmatprep.subr.bf16.mxu1 %v4860_v55  ;;  %v4927_v55 = vld [vmem:[%s5406_s23 + $0x980] ss:$16 sps:$4 sm:$0xff]  }
 0x31c   : > { %3260 = vmatpush2.bf16.msra.mxu0 %v4855_v45  ;;  %v4932_v45 = vld [vmem:[%s5406_s23 + $0x1ac] ss:$16 sps:$4 sm:$0xff]  }
 0x31d   : > { %3301 = vmatpush2.bf16.msra.mxu1 %v4858_v56  ;;  %3311 = vmatprep.subr.bf16.mxu0 %v4863_v60  ;;  %v4935_v56 = vld [vmem:[%s5406_s23 + $0x964] ss:$16 sps:$4 sm:$0xff]   ;;  %v4933_v60 = vld [vmem:[%s5406_s23 + $0x960] ss:$16 sps:$4 sm:$0xff]  }
 0x31e   : > { %3366 = vmatprep.subr.bf16.mxu1 %v4866_v7  ;;  %v4938_v7 = vld [vmem:[%s5406_s23 + $0x18c] ss:$16 sps:$4 sm:$0xff]  }
 0x31f   : > { %3262 = vmatmul.mubr.bf16.vlgmr.msra.gmra.mxu0 %v5960_v57 }
 0x320   : > { %3303 = vmatmul.mubr.bf16.vlgmr.msra.gmra.mxu1 %v5967_v62  ;;  %3312 = vmatpush1.bf16.msra.mxu0 %v4861_v63  ;;  %v4936_v63 = vld [vmem:[%s5406_s23 + $0x188] ss:$16 sps:$4 sm:$0xff]  }
 0x321   : > { %3367 = vmatpush1.bf16.msra.mxu1 %v4864_v18  ;;  %3313 = vmatprep.subr.bf16.mxu0 %v4869_v0  ;;  %v4939_v18 = vld [vmem:[%s5406_s23 + $0x940] ss:$16 sps:$4 sm:$0xff]   ;;  %v4944_v0 = vld [vmem:[%s5406_s23 + $0x16c] ss:$16 sps:$4 sm:$0xff]  }
 0x322   : > { %3384 = vmatprep.mubr.bf16.mxu1 %v5272_v58  ;;  %3393 = vmatprep.subr.bf16.mxu1 %v4872_v1  ;;  %v4947_v1 = vld [vmem:[%s5406_s23 + $0x924] ss:$16 sps:$4 sm:$0xff]  }
 0x323   : > { %3343 = vmatprep.mubr.bf16.mxu0 %v5974_v3 }
 0x324   : > { %3314 = vmatpush1.bf16.msra.mxu0 %v4867_v6  ;;  %v4942_v6 = vld [vmem:[%s5406_s23 + $0x168] ss:$16 sps:$4 sm:$0xff]  }
 0x325   : > { %3315 = vmatprep.subr.bf16.mxu0 %v4875_v27  ;;  %v4945_v27 = vld [vmem:[%s5406_s23 + $0x920] ss:$16 sps:$4 sm:$0xff]  }
 0x328   : > { %4347 = vmatmul.mubr.msk.bf16.vlgmr.msra.gmra.mxu1 %vm3143_vm3, %v5989_v13  ;;  %3316 = vmatpush1.bf16.msra.mxu0 %v4873_v11  ;;  %v4953_v11 = vld [vmem:[%s5406_s23 + $0x904] ss:$16 sps:$4 sm:$0xff]  }
 0x329   : > { %3394 = vmatpush1.bf16.msra.mxu1 %v4870_v9  ;;  %3317 = vmatprep.subr.bf16.mxu0 %v4881_v10  ;;  %v4950_v9 = vld [vmem:[%s5406_s23 + $0x14c] ss:$16 sps:$4 sm:$0xff]   ;;  %v4951_v10 = vld [vmem:[%s5406_s23 + $0x900] ss:$16 sps:$4 sm:$0xff]  }
 0x32a   : > { %3395 = vmatprep.subr.bf16.mxu1 %v4878_v14  ;;  %3425 = vmatprep.mubr.bf16.mxu1 %v5851_v23  ;;  %v4896_v23 = vld [vmem:[%s5406_s23 + $0x6c] ss:$16 sps:$4 sm:$0xff]   ;;  %v4948_v14 = vld [vmem:[%s5406_s23 + $0x148] ss:$16 sps:$4 sm:$0xff]  }
 0x32c   : > { %3318 = vmatpush1.bf16.msra.mxu0 %v4879_v15  ;;  %v4959_v15 = vld [vmem:[%s5406_s23 + $0x2ec] ss:$16 sps:$4 sm:$0xff]  }
 0x32d   : > { %3396 = vmatpush1.bf16.msra.mxu1 %v4876_v12  ;;  %3319 = vmatprep.subr.bf16.mxu0 %v4887_v17  ;;  %v4956_v12 = vld [vmem:[%s5406_s23 + $0x12c] ss:$16 sps:$4 sm:$0xff]   ;;  %v4957_v17 = vld [vmem:[%s5406_s23 + $0x2e8] ss:$16 sps:$4 sm:$0xff]  }
 0x32e   : > { %3397 = vmatprep.subr.bf16.mxu1 %v4884_v33  ;;  %v4954_v33 = vld [vmem:[%s5406_s23 + $0x128] ss:$16 sps:$4 sm:$0xff]  }
 0x330   : > { %3320 = vmatpush1.bf16.msra.mxu0 %v4885_v20  ;;  %v4965_v20 = vld [vmem:[%s5406_s23 + $0x2cc] ss:$16 sps:$4 sm:$0xff]  }
 0x331   : > { %3398 = vmatpush1.bf16.msra.mxu1 %v4882_v19  ;;  %3321 = vmatprep.subr.bf16.mxu0 %v4893_v22  ;;  %v4962_v19 = vld [vmem:[%s5406_s23 + $0x10c] ss:$16 sps:$4 sm:$0xff]   ;;  %v4963_v22 = vld [vmem:[%s5406_s23 + $0x2c8] ss:$16 sps:$4 sm:$0xff]  }
 0x332   : > { %3399 = vmatprep.subr.bf16.mxu1 %v4890_v21  ;;  %v4960_v21 = vld [vmem:[%s5406_s23 + $0x108] ss:$16 sps:$4 sm:$0xff]  }
 0x334   : > { %3322 = vmatpush1.bf16.msra.mxu0 %v4891_v31  ;;  %v4971_v31 = vld [vmem:[%s5406_s23 + $0x2ac] ss:$16 sps:$4 sm:$0xff]  }
 0x335   : > { %3400 = vmatpush1.bf16.msra.mxu1 %v4888_v24  ;;  %3323 = vmatprep.subr.bf16.mxu0 %v4899_v25  ;;  %v4968_v24 = vld [vmem:[%s5406_s23 + $0x4ec] ss:$16 sps:$4 sm:$0xff]   ;;  %v4969_v25 = vld [vmem:[%s5406_s23 + $0x2a8] ss:$16 sps:$4 sm:$0xff]  }
 0x336   : > { %3401 = vmatprep.subr.bf16.mxu1 %v4896_v23  ;;  %v4966_v23 = vld [vmem:[%s5406_s23 + $0x4e8] ss:$16 sps:$4 sm:$0xff]  }
 0x338   : > { %3324 = vmatpush1.bf16.msra.mxu0 %v4897_v16  ;;  %v4977_v16 = vld [vmem:[%s5406_s23 + $0x28c] ss:$16 sps:$4 sm:$0xff]  }
 0x339   : > { %3402 = vmatpush1.bf16.msra.mxu1 %v4894_v4  ;;  %3325 = vmatprep.subr.bf16.mxu0 %v4905_v29  ;;  %v4974_v4 = vld [vmem:[%s5406_s23 + $0x4cc] ss:$16 sps:$4 sm:$0xff]   ;;  %v4975_v29 = vld [vmem:[%s5406_s23 + $0x288] ss:$16 sps:$4 sm:$0xff]  }
 0x33a   : > { %3403 = vmatprep.subr.bf16.mxu1 %v4902_v28  ;;  %v4972_v28 = vld [vmem:[%s5406_s23 + $0x4c8] ss:$16 sps:$4 sm:$0xff]  }
 0x33c   : > { %3326 = vmatpush1.bf16.msra.mxu0 %v4903_v32  ;;  %v4978_v32 = vld [vmem:[%s5406_s23 + $0x4a8] ss:$16 sps:$4 sm:$0xff]  }
 0x33d   : > { %3404 = vmatpush1.bf16.msra.mxu1 %v4900_v30  ;;  %3327 = vmatprep.subr.bf16.mxu0 %v4911_v35  ;;  %v4983_v30 = vld [vmem:[%s5406_s23 + $0x26c] ss:$16 sps:$4 sm:$0xff]  }
 0x33e   : > { %3405 = vmatprep.subr.bf16.mxu1 %v4908_v34  ;;  %v4981_v34 = vld [vmem:[%s5406_s23 + $0x268] ss:$16 sps:$4 sm:$0xff]   ;;  %v4989_v35 = vld [vmem:[%s5406_s23 + $0x24c] ss:$16 sps:$4 sm:$0xff]  }
 0x340   : > { %3328 = vmatpush2.bf16.msra.mxu0 %v4909_v38  ;;  %v4987_v38 = vld [vmem:[%s5406_s23 + $0x248] ss:$16 sps:$4 sm:$0xff]  }
 0x341   : > { %3406 = vmatpush1.bf16.msra.mxu1 %v4906_v36  ;;  %3329 = vmatprep.subr.bf16.mxu0 %v4917_v42  ;;  %v4984_v36 = vld [vmem:[%s5406_s23 + $0x488] ss:$16 sps:$4 sm:$0xff]  }
 0x342   : > { %3407 = vmatprep.subr.bf16.mxu1 %v4914_v39  ;;  %v4995_v39 = vld [vmem:[%s5406_s23 + $0x22c] ss:$16 sps:$4 sm:$0xff]   ;;  %v4990_v42 = vld [vmem:[%s5406_s23 + $0x468] ss:$16 sps:$4 sm:$0xff]  }
 0x344   : > { %3330 = vmatpush2.bf16.msra.mxu0 %v4915_v44  ;;  %v4998_v44 = vld [vmem:[%s5406_s23 + $0x44c] ss:$16 sps:$4 sm:$0xff]  }
 0x345   : > { %3408 = vmatpush1.bf16.msra.mxu1 %v4912_v43  ;;  %3331 = vmatprep.subr.bf16.mxu0 %v4923_v48  ;;  %v4993_v43 = vld [vmem:[%s5406_s23 + $0x228] ss:$16 sps:$4 sm:$0xff]  }
 0x346   : > { %3409 = vmatprep.subr.bf16.mxu1 %v4920_v46  ;;  %v5001_v46 = vld [vmem:[%s5406_s23 + $0x20c] ss:$16 sps:$4 sm:$0xff]   ;;  %v4996_v48 = vld [vmem:[%s5406_s23 + $0x448] ss:$16 sps:$4 sm:$0xff]  }
 0x348   : > { %3332 = vmatpush2.bf16.msra.mxu0 %v4921_v50  ;;  %v5004_v50 = vld [vmem:[%s5406_s23 + $0x42c] ss:$16 sps:$4 sm:$0xff]  }
 0x349   : > { %3410 = vmatpush2.bf16.msra.mxu1 %v4918_v49  ;;  %3333 = vmatprep.subr.bf16.mxu0 %v4929_v53  ;;  %v4999_v49 = vld [vmem:[%s5406_s23 + $0x208] ss:$16 sps:$4 sm:$0xff]  }
 0x34a   : > { %3411 = vmatprep.subr.bf16.mxu1 %v4926_v52  ;;  %v5007_v52 = vld [vmem:[%s5406_s23 + $0x3ec] ss:$16 sps:$4 sm:$0xff]   ;;  %v5002_v53 = vld [vmem:[%s5406_s23 + $0x428] ss:$16 sps:$4 sm:$0xff]  }
 0x34c   : > { %3334 = vmatpush2.bf16.msra.mxu0 %v4927_v55  ;;  %v5010_v55 = vld [vmem:[%s5406_s23 + $0x40c] ss:$16 sps:$4 sm:$0xff]  }
 0x34d   : > { %3412 = vmatpush2.bf16.msra.mxu1 %v4924_v54  ;;  %3335 = vmatprep.subr.bf16.mxu0 %v4935_v56  ;;  %v5005_v54 = vld [vmem:[%s5406_s23 + $0x3e8] ss:$16 sps:$4 sm:$0xff]  }
 0x34e   : > { %3413 = vmatprep.subr.bf16.mxu1 %v4932_v45  ;;  %v5013_v45 = vld [vmem:[%s5406_s23 + $0x3cc] ss:$16 sps:$4 sm:$0xff]   ;;  %v5008_v56 = vld [vmem:[%s5406_s23 + $0x408] ss:$16 sps:$4 sm:$0xff]  }
 0x350   : > { %3336 = vmatpush2.bf16.msra.mxu0 %v4933_v60  ;;  %v5016_v60 = vld [vmem:[%s5406_s23 + $0x5ec] ss:$16 sps:$4 sm:$0xff]  }
 0x351   : > { %3414 = vmatpush2.bf16.msra.mxu1 %v4930_v59  ;;  %3337 = vmatprep.subr.bf16.mxu0 %v4941_v61  ;;  %v5011_v59 = vld [vmem:[%s5406_s23 + $0x3c8] ss:$16 sps:$4 sm:$0xff]  }
 0x352   : > { %3415 = vmatprep.subr.bf16.mxu1 %v4938_v7  ;;  %v5019_v7 = vld [vmem:[%s5406_s23 + $0x3ac] ss:$16 sps:$4 sm:$0xff]   ;;  %v5014_v61 = vld [vmem:[%s5406_s23 + $0x5e8] ss:$16 sps:$4 sm:$0xff]  }
 0x354   : > { %3338 = vmatpush2.bf16.msra.mxu0 %v4939_v18  ;;  %v5022_v18 = vld [vmem:[%s5406_s23 + $0x5cc] ss:$16 sps:$4 sm:$0xff]  }
 0x355   : > { %3416 = vmatpush2.bf16.msra.mxu1 %v4936_v63  ;;  %3339 = vmatprep.subr.bf16.mxu0 %v4947_v1  ;;  %v5017_v63 = vld [vmem:[%s5406_s23 + $0x3a8] ss:$16 sps:$4 sm:$0xff]  }
 0x356   : > { %3417 = vmatprep.subr.bf16.mxu1 %v4944_v0  ;;  %v5025_v0 = vld [vmem:[%s5406_s23 + $0x38c] ss:$16 sps:$4 sm:$0xff]   ;;  %v5020_v1 = vld [vmem:[%s5406_s23 + $0x5c8] ss:$16 sps:$4 sm:$0xff]  }
 0x358   : > { %3340 = vmatpush2.bf16.msra.mxu0 %v4945_v27  ;;  %v5028_v27 = vld [vmem:[%s5406_s23 + $0x5ac] ss:$16 sps:$4 sm:$0xff]  }
 0x359   : > { %3418 = vmatpush2.bf16.msra.mxu1 %v4942_v6  ;;  %3341 = vmatprep.subr.bf16.mxu0 %v4953_v11  ;;  %v5023_v6 = vld [vmem:[%s5406_s23 + $0x388] ss:$16 sps:$4 sm:$0xff]  }
 0x35a   : > { %3419 = vmatprep.subr.bf16.mxu1 %v4950_v9  ;;  %v5031_v9 = vld [vmem:[%s5406_s23 + $0x36c] ss:$16 sps:$4 sm:$0xff]   ;;  %v5026_v11 = vld [vmem:[%s5406_s23 + $0x5a8] ss:$16 sps:$4 sm:$0xff]  }
 0x35c   : > { %3342 = vmatpush2.bf16.msra.mxu0 %v4951_v10  ;;  %v5034_v10 = vld [vmem:[%s5406_s23 + $0x58c] ss:$16 sps:$4 sm:$0xff]  }
 0x35d   : > { %3420 = vmatpush2.bf16.msra.mxu1 %v4948_v14  ;;  %3434 = vmatprep.subr.bf16.mxu0 %v4959_v15  ;;  %v5029_v14 = vld [vmem:[%s5406_s23 + $0x368] ss:$16 sps:$4 sm:$0xff]  }
 0x35e   : > { %3421 = vmatprep.subr.bf16.mxu1 %v4956_v12  ;;  %v5037_v12 = vld [vmem:[%s5406_s23 + $0x34c] ss:$16 sps:$4 sm:$0xff]   ;;  %v5032_v15 = vld [vmem:[%s5406_s23 + $0x588] ss:$16 sps:$4 sm:$0xff]  }
 0x35f   : > { %3344 = vmatmul.mubr.bf16.vlgmr.msra.gmra.mxu0 %v5979_v5 }
 0x360   : > { %3435 = vmatpush1.bf16.msra.mxu0 %v4957_v17  ;;  %3466 = vmatprep.mubr.bf16.mxu0 %v5858_v26  ;;  %v4980_v26 = vld [vmem:[%s5406_s23 + $0x4ac] ss:$16 sps:$4 sm:$0xff]  }
 0x361   : > { %3422 = vmatpush2.bf16.msra.mxu1 %v4954_v33  ;;  %3436 = vmatprep.subr.bf16.mxu0 %v4965_v20  ;;  %v5035_v33 = vld [vmem:[%s5406_s23 + $0x348] ss:$16 sps:$4 sm:$0xff]   ;;  %v5040_v17 = vld [vmem:[%s5406_s23 + $0x56c] ss:$16 sps:$4 sm:$0xff]  }
 0x362   : > { %3423 = vmatprep.subr.bf16.mxu1 %v4962_v19  ;;  %v5043_v19 = vld [vmem:[%s5406_s23 + $0x32c] ss:$16 sps:$4 sm:$0xff]   ;;  %v5038_v20 = vld [vmem:[%s5406_s23 + $0x568] ss:$16 sps:$4 sm:$0xff]  }
 0x364   : > { %3437 = vmatpush1.bf16.msra.mxu0 %v4963_v22  ;;  %v5046_v22 = vld [vmem:[%s5406_s23 + $0x54c] ss:$16 sps:$4 sm:$0xff]  }
 0x365   : > { %3424 = vmatpush2.bf16.msra.mxu1 %v4960_v21  ;;  %3438 = vmatprep.subr.bf16.mxu0 %v4971_v31  ;;  %v5041_v21 = vld [vmem:[%s5406_s23 + $0x328] ss:$16 sps:$4 sm:$0xff]  }
 0x366   : > { %3475 = vmatprep.subr.bf16.mxu1 %v4968_v24  ;;  %v5049_v24 = vld [vmem:[%s5406_s23 + $0x30c] ss:$16 sps:$4 sm:$0xff]   ;;  %v5044_v31 = vld [vmem:[%s5406_s23 + $0x548] ss:$16 sps:$4 sm:$0xff]  }
 0x368   : > { %3426 = vmatmul.mubr.bf16.vlgmr.msra.gmra.mxu1 %v5875_v37  ;;  %3439 = vmatpush1.bf16.msra.mxu0 %v4969_v25  ;;  %v4986_v37 = vld [vmem:[%s5406_s23 + $0x48c] ss:$16 sps:$4 sm:$0xff]  }
 0x369   : > { %3476 = vmatpush1.bf16.msra.mxu1 %v4966_v23  ;;  %3440 = vmatprep.subr.bf16.mxu0 %v4977_v16  ;;  %v5047_v23 = vld [vmem:[%s5406_s23 + $0x308] ss:$16 sps:$4 sm:$0xff]   ;;  %v5052_v25 = vld [vmem:[%s5406_s23 + $0x52c] ss:$16 sps:$4 sm:$0xff]  }
 0x36a   : > { %3477 = vmatprep.subr.bf16.mxu1 %v4974_v4  ;;  %3507 = vmatprep.mubr.bf16.mxu1 %v5880_v40  ;;  %v4992_v40 = vld [vmem:[%s5406_s23 + $0x46c] ss:$16 sps:$4 sm:$0xff]   ;;  %v5050_v16 = vld [vmem:[%s5406_s23 + $0x528] ss:$16 sps:$4 sm:$0xff]  }
 0x36b   : > { %v5055_v4 = vld [vmem:[%s5406_s23 + $0x6ec] ss:$16 sps:$4 sm:$0xff]  }
 0x36c   : > { %3441 = vmatpush1.bf16.msra.mxu0 %v4975_v29  ;;  %v5058_v29 = vld [vmem:[%s5406_s23 + $0x50c] ss:$16 sps:$4 sm:$0xff]  }
 0x36d   : > { %3478 = vmatpush1.bf16.msra.mxu1 %v4972_v28  ;;  %3442 = vmatprep.subr.bf16.mxu0 %v4983_v30  ;;  %v5053_v28 = vld [vmem:[%s5406_s23 + $0x6e8] ss:$16 sps:$4 sm:$0xff]  }
 0x36e   : > { %3479 = vmatprep.subr.bf16.mxu1 %v4980_v26  ;;  %v5061_v26 = vld [vmem:[%s5406_s23 + $0x6cc] ss:$16 sps:$4 sm:$0xff]  }
 0x370   : > { %3443 = vmatpush1.bf16.msra.mxu0 %v4981_v34 }
 0x371   : > { %3480 = vmatpush1.bf16.msra.mxu1 %v4978_v32  ;;  %3444 = vmatprep.subr.bf16.mxu0 %v4989_v35  ;;  %v5059_v35 = vld [vmem:[%s5406_s23 + $0x6c8] ss:$16 sps:$4 sm:$0xff]  }
 0x372   : > { %3481 = vmatprep.subr.bf16.mxu1 %v4986_v37  ;;  %v5056_v37 = vld [vmem:[%s5406_s23 + $0x508] ss:$16 sps:$4 sm:$0xff]  }
 0x374   : > { %3445 = vmatpush1.bf16.msra.mxu0 %v4987_v38 }
 0x375   : > { %3482 = vmatpush1.bf16.msra.mxu1 %v4984_v36  ;;  %3446 = vmatprep.subr.bf16.mxu0 %v4995_v39  ;;  %v5067_v39 = vld [vmem:[%s5406_s23 + $0x6ac] ss:$16 sps:$4 sm:$0xff]  }
 0x376   : > { %3483 = vmatprep.subr.bf16.mxu1 %v4992_v40  ;;  %v5064_v40 = vld [vmem:[%s5406_s23 + $0x8ec] ss:$16 sps:$4 sm:$0xff]  }
 0x378   : > { %3447 = vmatpush1.bf16.msra.mxu0 %v4993_v43 }
 0x379   : > { %3484 = vmatpush1.bf16.msra.mxu1 %v4990_v42  ;;  %3448 = vmatprep.subr.bf16.mxu0 %v5001_v46  ;;  %v5065_v46 = vld [vmem:[%s5406_s23 + $0x6a8] ss:$16 sps:$4 sm:$0xff]  }
 0x37a   : > { %3485 = vmatprep.subr.bf16.mxu1 %v4998_v44  ;;  %v5062_v44 = vld [vmem:[%s5406_s23 + $0x8e8] ss:$16 sps:$4 sm:$0xff]  }
 0x37c   : > { %3449 = vmatpush1.bf16.msra.mxu0 %v4999_v49 }
 0x37d   : > { %3486 = vmatpush1.bf16.msra.mxu1 %v4996_v48  ;;  %3450 = vmatprep.subr.bf16.mxu0 %v5007_v52  ;;  %v5073_v52 = vld [vmem:[%s5406_s23 + $0x68c] ss:$16 sps:$4 sm:$0xff]  }
 0x37e   : > { %3487 = vmatprep.subr.bf16.mxu1 %v5004_v50  ;;  %v5070_v50 = vld [vmem:[%s5406_s23 + $0x8cc] ss:$16 sps:$4 sm:$0xff]  }
 0x380   : > { %3451 = vmatpush2.bf16.msra.mxu0 %v5005_v54  ;;  %v5076_v54 = vld [vmem:[%s5406_s23 + $0x8ac] ss:$16 sps:$4 sm:$0xff]  }
 0x381   : > { %3488 = vmatpush1.bf16.msra.mxu1 %v5002_v53  ;;  %3452 = vmatprep.subr.bf16.mxu0 %v5013_v45  ;;  %v5071_v53 = vld [vmem:[%s5406_s23 + $0x688] ss:$16 sps:$4 sm:$0xff]  }
 0x382   : > { %3489 = vmatprep.subr.bf16.mxu1 %v5010_v55  ;;  %v5079_v55 = vld [vmem:[%s5406_s23 + $0x66c] ss:$16 sps:$4 sm:$0xff]   ;;  %v5074_v45 = vld [vmem:[%s5406_s23 + $0x8a8] ss:$16 sps:$4 sm:$0xff]  }
 0x384   : > { %3453 = vmatpush2.bf16.msra.mxu0 %v5011_v59  ;;  %v5085_v59 = vld [vmem:[%s5406_s23 + $0x64c] ss:$16 sps:$4 sm:$0xff]  }
 0x385   : > { %3490 = vmatpush1.bf16.msra.mxu1 %v5008_v56  ;;  %3454 = vmatprep.subr.bf16.mxu0 %v5019_v7  ;;  %v5082_v56 = vld [vmem:[%s5406_s23 + $0x88c] ss:$16 sps:$4 sm:$0xff]   ;;  %v5083_v7 = vld [vmem:[%s5406_s23 + $0x648] ss:$16 sps:$4 sm:$0xff]  }
 0x386   : > { %3491 = vmatprep.subr.bf16.mxu1 %v5016_v60  ;;  %v5080_v60 = vld [vmem:[%s5406_s23 + $0x888] ss:$16 sps:$4 sm:$0xff]  }
 0x388   : > { %3455 = vmatpush2.bf16.msra.mxu0 %v5017_v63  ;;  %v5086_v63 = vld [vmem:[%s5406_s23 + $0x868] ss:$16 sps:$4 sm:$0xff]  }
 0x389   : > { %3492 = vmatpush2.bf16.msra.mxu1 %v5014_v61  ;;  %3456 = vmatprep.subr.bf16.mxu0 %v5025_v0  ;;  %v5091_v61 = vld [vmem:[%s5406_s23 + $0x62c] ss:$16 sps:$4 sm:$0xff]  }
 0x38a   : > { %3493 = vmatprep.subr.bf16.mxu1 %v5022_v18  ;;  %v5089_v18 = vld [vmem:[%s5406_s23 + $0x628] ss:$16 sps:$4 sm:$0xff]   ;;  %v5094_v0 = vld [vmem:[%s5406_s23 + $0x84c] ss:$16 sps:$4 sm:$0xff]  }
 0x38c   : > { %3457 = vmatpush2.bf16.msra.mxu0 %v5023_v6  ;;  %v5092_v6 = vld [vmem:[%s5406_s23 + $0x848] ss:$16 sps:$4 sm:$0xff]  }
 0x38d   : > { %3494 = vmatpush2.bf16.msra.mxu1 %v5020_v1  ;;  %3458 = vmatprep.subr.bf16.mxu0 %v5031_v9  ;;  %v5097_v1 = vld [vmem:[%s5406_s23 + $0x60c] ss:$16 sps:$4 sm:$0xff]  }
 0x38e   : > { %3495 = vmatprep.subr.bf16.mxu1 %v5028_v27  ;;  %v5095_v27 = vld [vmem:[%s5406_s23 + $0x608] ss:$16 sps:$4 sm:$0xff]   ;;  %v5100_v9 = vld [vmem:[%s5406_s23 + $0x82c] ss:$16 sps:$4 sm:$0xff]  }
 0x390   : > { %3459 = vmatpush2.bf16.msra.mxu0 %v5029_v14  ;;  %v5098_v14 = vld [vmem:[%s5406_s23 + $0x828] ss:$16 sps:$4 sm:$0xff]  }
 0x391   : > { %3496 = vmatpush2.bf16.msra.mxu1 %v5026_v11  ;;  %3460 = vmatprep.subr.bf16.mxu0 %v5037_v12  ;;  %v5103_v11 = vld [vmem:[%s5406_s23 + $0x7ec] ss:$16 sps:$4 sm:$0xff]  }
 0x392   : > { %3497 = vmatprep.subr.bf16.mxu1 %v5034_v10  ;;  %v5101_v10 = vld [vmem:[%s5406_s23 + $0x7e8] ss:$16 sps:$4 sm:$0xff]   ;;  %v5106_v12 = vld [vmem:[%s5406_s23 + $0x80c] ss:$16 sps:$4 sm:$0xff]  }
 0x394   : > { %3461 = vmatpush2.bf16.msra.mxu0 %v5035_v33  ;;  %v5104_v33 = vld [vmem:[%s5406_s23 + $0x808] ss:$16 sps:$4 sm:$0xff]  }
 0x395   : > { %3498 = vmatpush2.bf16.msra.mxu1 %v5032_v15  ;;  %3462 = vmatprep.subr.bf16.mxu0 %v5043_v19  ;;  %v5109_v15 = vld [vmem:[%s5406_s23 + $0x7cc] ss:$16 sps:$4 sm:$0xff]  }
 0x396   : > { %3499 = vmatprep.subr.bf16.mxu1 %v5040_v17  ;;  %v5107_v17 = vld [vmem:[%s5406_s23 + $0x7c8] ss:$16 sps:$4 sm:$0xff]   ;;  %v5112_v19 = vld [vmem:[%s5406_s23 + $0x9ec] ss:$16 sps:$4 sm:$0xff]  }
 0x398   : > { %3463 = vmatpush2.bf16.msra.mxu0 %v5041_v21  ;;  %v5110_v21 = vld [vmem:[%s5406_s23 + $0x9e8] ss:$16 sps:$4 sm:$0xff]  }
 0x399   : > { %3500 = vmatpush2.bf16.msra.mxu1 %v5038_v20  ;;  %3464 = vmatprep.subr.bf16.mxu0 %v5049_v24  ;;  %v5115_v20 = vld [vmem:[%s5406_s23 + $0x7ac] ss:$16 sps:$4 sm:$0xff]  }
 0x39a   : > { %3501 = vmatprep.subr.bf16.mxu1 %v5046_v22  ;;  %v5113_v22 = vld [vmem:[%s5406_s23 + $0x7a8] ss:$16 sps:$4 sm:$0xff]   ;;  %v5118_v24 = vld [vmem:[%s5406_s23 + $0x9cc] ss:$16 sps:$4 sm:$0xff]  }
 0x39c   : > { %3465 = vmatpush2.bf16.msra.mxu0 %v5047_v23  ;;  %v5116_v23 = vld [vmem:[%s5406_s23 + $0x9c8] ss:$16 sps:$4 sm:$0xff]  }
 0x39d   : > { %3502 = vmatpush2.bf16.msra.mxu1 %v5044_v31  ;;  %3516 = vmatprep.subr.bf16.mxu0 %v5055_v4  ;;  %v5121_v31 = vld [vmem:[%s5406_s23 + $0x78c] ss:$16 sps:$4 sm:$0xff]  }
 0x39e   : > { %3503 = vmatprep.subr.bf16.mxu1 %v5052_v25  ;;  %v5119_v25 = vld [vmem:[%s5406_s23 + $0x788] ss:$16 sps:$4 sm:$0xff]   ;;  %v5124_v4 = vld [vmem:[%s5406_s23 + $0x9ac] ss:$16 sps:$4 sm:$0xff]  }
 0x39f   : > { %v3181_v30 = vpop.f32.mrf.mxu0  ;;  %3467 = vmatmul.mubr.bf16.vlgmr.msra.gmra.mxu0 %v5884_v41 }
 0x3a0   : > { %v3222_v32 = vpop.f32.mrf.mxu1  ;;  %3517 = vmatpush1.bf16.msra.mxu0 %v5053_v28  ;;  %3548 = vmatprep.mubr.bf16.mxu0 %v5892_v47  ;;  %v5068_v47 = vld [vmem:[%s5406_s23 + $0x8c8] ss:$16 sps:$4 sm:$0xff]  }
 0x3a1   : > { %v6121_v34 = vadd.f32 %v3222_v32, %v3181_v30  ;;  %3504 = vmatpush2.bf16.msra.mxu1 %v5050_v16  ;;  %v3183_v36 = vpop.f32.mrf.mxu0  ;;  %3518 = vmatprep.subr.bf16.mxu0 %v5061_v26  ;;  %v5127_v16 = vld [vmem:[%s5406_s23 + $0x76c] ss:$16 sps:$4 sm:$0xff]   ;;  %v5122_v28 = vld [vmem:[%s5406_s23 + $0x9a8] ss:$16 sps:$4 sm:$0xff]  }
 0x3a2   : > { %v3224_v38 = vpop.f32.mrf.mxu1  ;;  %3505 = vmatprep.subr.bf16.mxu1 %v5058_v29  ;;  %v5125_v29 = vld [vmem:[%s5406_s23 + $0x768] ss:$16 sps:$4 sm:$0xff]   ;;  %v5130_v26 = vld [vmem:[%s5406_s23 + $0x98c] ss:$16 sps:$4 sm:$0xff]  }
 0x3a3   : > { %v6127_v42 = vadd.f32 %v3224_v38, %v3183_v36  ;;  %v3185_v41 = vpop.f32.mrf.mxu0  ;;  %v5133_v30 = vld [vmem:[%s5406_s23 + $0x74c] ss:$16 sps:$4 sm:$0xff]   ;;  %v5128_v32 = vld [vmem:[%s5406_s23 + $0x988] ss:$16 sps:$4 sm:$0xff]  }
 0x3a4   : > { %v3226_v43 = vpop.f32.mrf.mxu1  ;;  %3519 = vmatpush1.bf16.msra.mxu0 %v5059_v35  ;;  %v5136_v35 = vld [vmem:[%s5406_s23 + $0x96c] ss:$16 sps:$4 sm:$0xff]   ;;  %v5134_v38 = vld [vmem:[%s5406_s23 + $0x968] ss:$16 sps:$4 sm:$0xff]  }
 0x3a5   : > { %3506 = vmatpush2.bf16.msra.mxu1 %v5056_v37  ;;  %v3186_v48 = vpop.f32.mrf.mxu0  ;;  %3520 = vmatprep.subr.bf16.mxu0 %v5067_v39  ;;  %v5131_v37 = vld [vmem:[%s5406_s23 + $0x748] ss:$16 sps:$4 sm:$0xff]   ;;  %v5139_v36 = vld [vmem:[%s5406_s23 + $0x72c] ss:$16 sps:$4 sm:$0xff]  }
 0x3a6   : > { %v3227_v49 = vpop.f32.mrf.mxu1  ;;  %3557 = vmatprep.subr.bf16.mxu1 %v5064_v40  ;;  %v5137_v40 = vld [vmem:[%s5406_s23 + $0x728] ss:$16 sps:$4 sm:$0xff]   ;;  %v5142_v39 = vld [vmem:[%s5406_s23 + $0x94c] ss:$16 sps:$4 sm:$0xff]  }
 0x3a7   : > { %v5145_v41 = vld [vmem:[%s5406_s23 + $0x70c] ss:$16 sps:$4 sm:$0xff]   ;;  %v5140_v43 = vld [vmem:[%s5406_s23 + $0x948] ss:$16 sps:$4 sm:$0xff]  }
 0x3a8   : > { %3508 = vmatmul.mubr.bf16.vlgmr.msra.gmra.mxu1 %v5960_v57  ;;  %3521 = vmatpush1.bf16.msra.mxu0 %v5065_v46  ;;  %v5077_v57 = vld [vmem:[%s5406_s23 + $0x668] ss:$16 sps:$4 sm:$0xff]   ;;  %v5148_v46 = vld [vmem:[%s5406_s23 + $0x92c] ss:$16 sps:$4 sm:$0xff]  }
 0x3a9   : > { %3558 = vmatpush1.bf16.msra.mxu1 %v5062_v44  ;;  %3522 = vmatprep.subr.bf16.mxu0 %v5073_v52  ;;  %v5143_v44 = vld [vmem:[%s5406_s23 + $0x708] ss:$16 sps:$4 sm:$0xff]   ;;  %v5151_v48 = vld [vmem:[%s5406_s23 + $0xa0c] ss:$16 sps:$4 sm:$0xff]  }
 0x3aa   : > { %3559 = vmatprep.subr.bf16.mxu1 %v5070_v50  ;;  %3589 = vmatprep.mubr.bf16.mxu1 %v5974_v3  ;;  %v5088_v3 = vld [vmem:[%s5406_s23 + $0x86c] ss:$16 sps:$4 sm:$0xff]   ;;  %v5146_v49 = vld [vmem:[%s5406_s23 + $0x928] ss:$16 sps:$4 sm:$0xff]  }
 0x3ab   : > { %v5149_v50 = vld [vmem:[%s5406_s23 + $0xa08] ss:$16 sps:$4 sm:$0xff]   ;;  %v5154_v52 = vld [vmem:[%s5406_s23 + $0x90c] ss:$16 sps:$4 sm:$0xff]  }
 0x3ac   : > { %3523 = vmatpush1.bf16.msra.mxu0 %v5071_v53 }
 0x3ad   : > { %3560 = vmatpush1.bf16.msra.mxu1 %v5068_v47  ;;  %3524 = vmatprep.subr.bf16.mxu0 %v5079_v55  ;;  %v5152_v55 = vld [vmem:[%s5406_s23 + $0x908] ss:$16 sps:$4 sm:$0xff]  }
 0x3ae   : > { %3561 = vmatprep.subr.bf16.mxu1 %v5076_v54 }
 0x3b0   : > { %3525 = vmatpush1.bf16.msra.mxu0 %v5077_v57 }
 0x3b1   : > { %3562 = vmatpush1.bf16.msra.mxu1 %v5074_v45  ;;  %3526 = vmatprep.subr.bf16.mxu0 %v5085_v59 }
 0x3b2   : > { %3563 = vmatprep.subr.bf16.mxu1 %v5082_v56 }
 0x3b4   : > { %3527 = vmatpush1.bf16.msra.mxu0 %v5083_v7 }
 0x3b5   : > { %3564 = vmatpush1.bf16.msra.mxu1 %v5080_v60  ;;  %3528 = vmatprep.subr.bf16.mxu0 %v5091_v61 }
 0x3b6   : > { %3565 = vmatprep.subr.bf16.mxu1 %v5088_v3 }
 0x3b8   : > { %3529 = vmatpush1.bf16.msra.mxu0 %v5089_v18 }
 0x3b9   : > { %3566 = vmatpush1.bf16.msra.mxu1 %v5086_v63  ;;  %3530 = vmatprep.subr.bf16.mxu0 %v5097_v1 }
 0x3ba   : > { %3567 = vmatprep.subr.bf16.mxu1 %v5094_v0 }
 0x3bc   : > { %3531 = vmatpush1.bf16.msra.mxu0 %v5095_v27 }
 0x3bd   : > { %3568 = vmatpush1.bf16.msra.mxu1 %v5092_v6  ;;  %3532 = vmatprep.subr.bf16.mxu0 %v5103_v11 }
 0x3be   : > { %3569 = vmatprep.subr.bf16.mxu1 %v5100_v9 }
 0x3c0   : > { %3533 = vmatpush2.bf16.msra.mxu0 %v5101_v10 }
 0x3c1   : > { %3570 = vmatpush1.bf16.msra.mxu1 %v5098_v14  ;;  %3534 = vmatprep.subr.bf16.mxu0 %v5109_v15 }
 0x3c2   : > { %3571 = vmatprep.subr.bf16.mxu1 %v5106_v12 }
 0x3c4   : > { %3535 = vmatpush2.bf16.msra.mxu0 %v5107_v17 }
 0x3c5   : > { %3572 = vmatpush1.bf16.msra.mxu1 %v5104_v33  ;;  %3536 = vmatprep.subr.bf16.mxu0 %v5115_v20 }
 0x3c6   : > { %3573 = vmatprep.subr.bf16.mxu1 %v5112_v19 }
 0x3c8   : > { %3537 = vmatpush2.bf16.msra.mxu0 %v5113_v22 }
 0x3c9   : > { %3574 = vmatpush2.bf16.msra.mxu1 %v5110_v21  ;;  %3538 = vmatprep.subr.bf16.mxu0 %v5121_v31 }
 0x3ca   : > { %3575 = vmatprep.subr.bf16.mxu1 %v5118_v24 }
 0x3cc   : > { %3539 = vmatpush2.bf16.msra.mxu0 %v5119_v25 }
 0x3cd   : > { %3576 = vmatpush2.bf16.msra.mxu1 %v5116_v23  ;;  %3540 = vmatprep.subr.bf16.mxu0 %v5127_v16 }
 0x3ce   : > { %3577 = vmatprep.subr.bf16.mxu1 %v5124_v4 }
 0x3d0   : > { %3541 = vmatpush2.bf16.msra.mxu0 %v5125_v29 }
 0x3d1   : > { %3578 = vmatpush2.bf16.msra.mxu1 %v5122_v28  ;;  %3542 = vmatprep.subr.bf16.mxu0 %v5133_v30 }
 0x3d2   : > { %3579 = vmatprep.subr.bf16.mxu1 %v5130_v26 }
 0x3d4   : > { %3543 = vmatpush2.bf16.msra.mxu0 %v5131_v37 }
 0x3d5   : > { %3580 = vmatpush2.bf16.msra.mxu1 %v5128_v32  ;;  %3544 = vmatprep.subr.bf16.mxu0 %v5139_v36 }
 0x3d6   : > { %3581 = vmatprep.subr.bf16.mxu1 %v5136_v35 }
 0x3d8   : > { %3545 = vmatpush2.bf16.msra.mxu0 %v5137_v40 }
 0x3d9   : > { %3582 = vmatpush2.bf16.msra.mxu1 %v5134_v38  ;;  %3546 = vmatprep.subr.bf16.mxu0 %v5145_v41 }
 0x3da   : > { %3583 = vmatprep.subr.bf16.mxu1 %v5142_v39 }
 0x3dc   : > { %3547 = vmatpush2.bf16.msra.mxu0 %v5143_v44 }
 0x3dd   : > { %3584 = vmatpush2.bf16.msra.mxu1 %v5140_v43  ;;  %3612 = vmatprep.subr.bf16.mxu0 %v5151_v48 }
 0x3de   : > { %3585 = vmatprep.subr.bf16.mxu1 %v5148_v46 }
 0x3df   : > { %v3263_v47 = vpop.f32.mrf.mxu0  ;;  %3549 = vmatmul.mubr.bf16.vlgmr.msra.gmra.mxu0 %v5967_v62 }
 0x3e0   : > { %v3304_v53 = vpop.f32.mrf.mxu1  ;;  %v3264_v54 = vadd.f32 %v3263_v47, %v6121_v34  ;;  %3613 = vmatpush1.bf16.msra.mxu0 %v5149_v50  ;;  %3630 = vmatprep.mubr.bf16.mxu0 %v5272_v58 }
 0x3e1   : > { %3586 = vmatpush2.bf16.msra.mxu1 %v5146_v49  ;;  %v3265_v45 = vpop.f32.mrf.mxu0 }
 0x3e2   : > { %v3306_v57 = vpop.f32.mrf.mxu1  ;;  %3587 = vmatprep.subr.bf16.mxu1 %v5154_v52  ;;  %v3305_v56 = vadd.f32 %v3304_v53, %v3264_v54  ;;  %v3266_v59 = vadd.f32 %v3265_v45, %v6127_v42 }
 0x3e3   : > { %v3267_v60 = vpop.f32.mrf.mxu0 }
 0x3e4   : > { %v3308_v7 = vpop.f32.mrf.mxu1  ;;  %v3307_v3 = vadd.f32 %v3306_v57, %v3266_v59 }
 0x3e5   : > { %3588 = vmatpush2.bf16.msra.mxu1 %v5152_v55  ;;  %v3268_v61 = vpop.f32.mrf.mxu0  ;;  %v1114_v55 = vld [vmem:[#allocation3] sm:$0xf] }
 0x3e6   : > { %v3309_v63 = vpop.f32.mrf.mxu1 }
 0x3e7   : > { %4348 = vmatmul.mubr.msk.bf16.vlgmr.msra.gmra.mxu0 %vm3143_vm3, %v5989_v13 }
 0x3e8   : > { %3590 = vmatmul.mubr.bf16.vlgmr.msra.gmra.mxu1 %v5979_v5  ;;  %v3386_v62 = vpop.f32.mrf.mxu1 }
 0x3ea   : > { %v3388_v34 = vpop.f32.mrf.mxu1 }
 0x3ec   : > { %v3390_v18 = vpop.f32.mrf.mxu1 }
 0x3ee   : > { %v3391_v0 = vpop.f32.mrf.mxu1 }
 0x41f   : > { %v3345_v1 = vpop.f32.mrf.mxu0 }
 0x420   : > { %v3346_v58 = vadd.f32 %v3345_v1, %v3305_v56 }
 0x421   : > { %v3347_v6 = vpop.f32.mrf.mxu0 }
 0x422   : > { %v3387_v27 = vadd.f32 %v3386_v62, %v3346_v58  ;;  %v3348_v42 = vadd.f32 %v3347_v6, %v3307_v3 }
 0x423   : > { %v3349_v9 = vpop.f32.mrf.mxu0 }
 0x424   : > { %v3389_v11 = vadd.f32 %v3388_v34, %v3348_v42 }
 0x425   : > { %v3350_v14 = vpop.f32.mrf.mxu0 }
 0x426   : > { %v3643_v10 = vcombine.low %v3387_v27, %v3389_v11 }
 0x428   : > { %v3427_v12 = vpop.f32.mrf.mxu1  ;;  %v3651_v47 = vrot.slane %v3643_v10, %v5837_v8 }
 0x42a   : > { %v3429_v15 = vpop.f32.mrf.mxu1 }
 0x42c   : > { %v3431_v33 = vpop.f32.mrf.mxu1 }
 0x42e   : > { %v3432_v5 = vpop.f32.mrf.mxu1 }
 0x45f   : > { %v3468_v17 = vpop.f32.mrf.mxu0 }
 0x460   : > { %v3469_v19 = vadd.f32 %v3468_v17, %v3427_v12 }
 0x461   : > { %v3470_v20 = vpop.f32.mrf.mxu0 }
 0x462   : > { %v3471_v13 = vadd.f32 %v3470_v20, %v3429_v15 }
 0x463   : > { %v3472_v21 = vpop.f32.mrf.mxu0 }
 0x465   : > { %v3473_v22 = vpop.f32.mrf.mxu0 }
 0x468   : > { %v3509_v24 = vpop.f32.mrf.mxu1 }
 0x469   : > { %v3510_v29 = vadd.f32 %v3509_v24, %v3469_v19 }
 0x46a   : > { %v3511_v31 = vpop.f32.mrf.mxu1 }
 0x46b   : > { %v3512_v30 = vadd.f32 %v3511_v31, %v3471_v13 }
 0x46c   : > { %v3513_v23 = vpop.f32.mrf.mxu1 }
 0x46e   : > { %v3514_v25 = vpop.f32.mrf.mxu1 }
 0x49f   : > { %v3550_v4 = vpop.f32.mrf.mxu0 }
 0x4a0   : > { %v3551_v32 = vadd.f32 %v3550_v4, %v3510_v29 }
 0x4a1   : > { %v3552_v16 = vpop.f32.mrf.mxu0 }
 0x4a2   : > { %v3553_v36 = vadd.f32 %v3552_v16, %v3512_v30 }
 0x4a3   : > { %v3554_v28 = vpop.f32.mrf.mxu0 }
 0x4a5   : > { %v3555_v26 = vpop.f32.mrf.mxu0 }
 0x4a7   : > { %v3632_v35 = vpop.f32.mrf.mxu0 }
 0x4a8   : > { %v3591_v37 = vpop.f32.mrf.mxu1 }
 0x4a9   : > { %v3592_v38 = vadd.f32 %v3591_v37, %v3551_v32  ;;  %v3634_v39 = vpop.f32.mrf.mxu0 }
 0x4aa   : > { %v3593_v40 = vpop.f32.mrf.mxu1 }
 0x4ab   : > { %v3594_v41 = vadd.f32 %v3593_v40, %v3553_v36  ;;  %v3636_v44 = vpop.f32.mrf.mxu0  ;;  %v3633_v46 = vadd.f32 %v3632_v35, %v3592_v38 }
 0x4ac   : > { %v3595_v43 = vpop.f32.mrf.mxu1 }
 0x4ad   : > { %v3635_v48 = vadd.f32 %v3634_v39, %v3594_v41  ;;  %v3637_v50 = vpop.f32.mrf.mxu0 }
 0x4ae   : > { %v3596_v49 = vpop.f32.mrf.mxu1 }
 0x4af   : > { %v3644_v52 = vcombine.low %v3633_v46, %v3635_v48 }
 0x4b1   : > { %v3658_v53 = vrot.slane %v3644_v52, %v5837_v8 }
 0x4b3   : > { %v3659_v54 = vcombine.low %v3651_v47, %v3658_v53 }
 0x4b5   : > { %v3666_v45 = vrot.slane %v3659_v54, %v5837_v8  ;;  %3676 = sbr.rel (%p4349_p1) target bundleno = 1882 (0x75a), region = 68 }
 0x4b7   : > { %v3668_v57 = vadd.f32 %v3666_v45, %v1114_v55 }
 0x4b9   : > { %3673 = vst.msk [vmem:[#allocation3] sm:$0xf] %vm3671_vm9, %v3668_v57 }
 0x4ba   : > { %v3709_v56 = vld [vmem:[%s6437_s7 + $0xf8] sm:$0xff]  ;;  %v3708_v8 = vld [vmem:[%s6437_s7 + $0xf0] sm:$0xff]  ;;  %v3707_v63 = vld [vmem:[%s6437_s7 + $0xe8] sm:$0xff]  ;;  %v3750_v49 = vsub.s32 1, %v5826_v2  ;;  %v3758_v53 = vsub.s32 3, %v5826_v2  ;;  %v3746_v45 = vsub.s32 0, %v5826_v2 }
 0x4bb   : > { %v3741_v59 = vld [vmem:[%s6437_s7 + $0x1f8] sm:$0xff]  ;;  %4390 = vmatprep.subr.mxu0 %v3709_v56  ;;  %v3740_v7 = vld [vmem:[%s6437_s7 + $0x1f0] sm:$0xff]  ;;  %v3739_v62 = vld [vmem:[%s6437_s7 + $0x1e8] sm:$0xff]  ;;  %v3754_v57 = vsub.s32 2, %v5826_v2  ;;  %vm3917_vm14 = vcmask 1040384   ;;  %vm3919_vm6 = vcmask 1041408  }
 0x4bc   : > { %v3693_v60 = vld [vmem:[%s6437_s7 + $0x78] sm:$0xff]  ;;  %4425 = vmatprep.subr.mxu1 %v3741_v59  ;;  %v3692_v3 = vld [vmem:[%s6437_s7 + $0x70] sm:$0xff]  ;;  %v3691_v34 = vld [vmem:[%s6437_s7 + $0x68] sm:$0xff]  ;;  %vm3921_vm7 = vcmask 1042432   ;;  %vm3923_vm4 = vcmask 125952  }
 0x4bd   : > { %v3725_v51 = vld [vmem:[%s6437_s7 + $0x178] sm:$0xff]  ;;  %4391 = vmatpush3.msra.mxu0 %v3693_v60  ;;  %v3724_v61 = vld [vmem:[%s6437_s7 + $0x170] sm:$0xff]  ;;  %v3723_v18 = vld [vmem:[%s6437_s7 + $0x168] sm:$0xff] }
 0x4be   : > { %4426 = vmatpush3.msra.mxu1 %v3725_v51  ;;  %4392 = vmatprep.subr.mxu0 %v3708_v8  ;;  %v3706_v0 = vld [vmem:[%s6437_s7 + $0xe0] sm:$0xff]  ;;  %v3705_v27 = vld [vmem:[%s6437_s7 + $0xd8] sm:$0xff]  ;;  %v3704_v14 = vld [vmem:[%s6437_s7 + $0xd0] sm:$0xff] }
 0x4bf   : > { %4427 = vmatprep.subr.mxu1 %v3740_v7  ;;  %4393 = vmatpush3.msra.mxu0 %v3692_v3  ;;  %v3738_v1 = vld [vmem:[%s6437_s7 + $0x1e0] sm:$0xff]  ;;  %v3737_v42 = vld [vmem:[%s6437_s7 + $0x1d8] sm:$0xff]  ;;  %v3736_v10 = vld [vmem:[%s6437_s7 + $0x1d0] sm:$0xff] }
 0x4c0   : > { %4428 = vmatpush3.msra.mxu1 %v3724_v61  ;;  %4394 = vmatprep.subr.mxu0 %v3707_v63  ;;  %v3690_v58 = vld [vmem:[%s6437_s7 + $0x60] sm:$0xff]  ;;  %v3689_v9 = vld [vmem:[%s6437_s7 + $0x58] sm:$0xff]  ;;  %v3688_v12 = vld [vmem:[%s6437_s7 + $0x50] sm:$0xff] }
 0x4c1   : > { %4429 = vmatprep.subr.mxu1 %v3739_v62  ;;  %v3722_v6 = vld [vmem:[%s6437_s7 + $0x160] sm:$0xff]  ;;  %4395 = vmatpush3.msra.mxu0 %v3691_v34  ;;  %v3721_v11 = vld [vmem:[%s6437_s7 + $0x158] sm:$0xff]  ;;  %v3720_v15 = vld [vmem:[%s6437_s7 + $0x150] sm:$0xff] }
 0x4c2   : > { %4430 = vmatpush3.msra.mxu1 %v3723_v18  ;;  %4396 = vmatprep.subr.mxu0 %v3706_v0  ;;  %v3703_v33 = vld [vmem:[%s6437_s7 + $0xc8] sm:$0xff]  ;;  %v3702_v20 = vld [vmem:[%s6437_s7 + $0xc0] sm:$0xff]  ;;  %v3701_v24 = vld [vmem:[%s6437_s7 + $0xb8] sm:$0xff] }
 0x4c3   : > { %4431 = vmatprep.subr.mxu1 %v3738_v1  ;;  %4397 = vmatpush3.msra.mxu0 %v3690_v58  ;;  %v3735_v5 = vld [vmem:[%s6437_s7 + $0x1c8] sm:$0xff]  ;;  %v3734_v13 = vld [vmem:[%s6437_s7 + $0x1c0] sm:$0xff]  ;;  %v3733_v31 = vld [vmem:[%s6437_s7 + $0x1b8] sm:$0xff] }
 0x4c4   : > { %4432 = vmatpush3.msra.mxu1 %v3722_v6  ;;  %4398 = vmatprep.subr.mxu0 %v3705_v27  ;;  %v3687_v17 = vld [vmem:[%s6437_s7 + $0x48] sm:$0xff]  ;;  %v3686_v21 = vld [vmem:[%s6437_s7 + $0x40] sm:$0xff]  ;;  %v3685_v23 = vld [vmem:[%s6437_s7 + $0x38] sm:$0xff] }
 0x4c5   : > { %4433 = vmatprep.subr.mxu1 %v3737_v42  ;;  %4399 = vmatpush3.msra.mxu0 %v3689_v9  ;;  %v3719_v19 = vld [vmem:[%s6437_s7 + $0x148] sm:$0xff]  ;;  %v3718_v22 = vld [vmem:[%s6437_s7 + $0x140] sm:$0xff]  ;;  %v3717_v25 = vld [vmem:[%s6437_s7 + $0x138] sm:$0xff] }
 0x4c6   : > { %4434 = vmatpush3.msra.mxu1 %v3721_v11  ;;  %4400 = vmatprep.subr.mxu0 %v3704_v14  ;;  %v3700_v4 = vld [vmem:[%s6437_s7 + $0xb0] sm:$0xff]  ;;  %v3699_v26 = vld [vmem:[%s6437_s7 + $0xa8] sm:$0xff]  ;;  %v3698_v35 = vld [vmem:[%s6437_s7 + $0xa0] sm:$0xff] }
 0x4c7   : > { %4435 = vmatprep.subr.mxu1 %v3736_v10  ;;  %4401 = vmatpush3.msra.mxu0 %v3688_v12  ;;  %v3732_v16 = vld [vmem:[%s6437_s7 + $0x1b0] sm:$0xff]  ;;  %v3731_v30 = vld [vmem:[%s6437_s7 + $0x1a8] sm:$0xff]  ;;  %v3730_v36 = vld [vmem:[%s6437_s7 + $0x1a0] sm:$0xff] }
 0x4c8   : > { %4436 = vmatpush3.msra.mxu1 %v3720_v15  ;;  %4402 = vmatprep.subr.mxu0 %v3703_v33  ;;  %v3684_v28 = vld [vmem:[%s6437_s7 + $0x30] sm:$0xff]  ;;  %v3683_v32 = vld [vmem:[%s6437_s7 + $0x28] sm:$0xff]  ;;  %v3682_v38 = vld [vmem:[%s6437_s7 + $0x20] sm:$0xff] }
 0x4c9   : > { %4437 = vmatprep.subr.mxu1 %v3735_v5  ;;  %4403 = vmatpush3.msra.mxu0 %v3687_v17  ;;  %v3716_v29 = vld [vmem:[%s6437_s7 + $0x130] sm:$0xff]  ;;  %v3715_v37 = vld [vmem:[%s6437_s7 + $0x128] sm:$0xff]  ;;  %v3714_v40 = vld [vmem:[%s6437_s7 + $0x120] sm:$0xff] }
 0x4ca   : > { %4438 = vmatpush3.msra.mxu1 %v3719_v19  ;;  %4404 = vmatprep.subr.mxu0 %v3702_v20  ;;  %v3697_v39 = vld [vmem:[%s6437_s7 + $0x98] sm:$0xff]  ;;  %v3696_v46 = vld [vmem:[%s6437_s7 + $0x90] sm:$0xff]  ;;  %v3695_v54 = vld [vmem:[%s6437_s7 + $0x88] sm:$0xff] }
 0x4cb   : > { %4439 = vmatprep.subr.mxu1 %v3734_v13  ;;  %4405 = vmatpush3.msra.mxu0 %v3686_v21  ;;  %v3729_v41 = vld [vmem:[%s6437_s7 + $0x198] sm:$0xff]  ;;  %v3728_v48 = vld [vmem:[%s6437_s7 + $0x190] sm:$0xff]  ;;  %v3727_v55 = vld [vmem:[%s6437_s7 + $0x188] sm:$0xff] }
 0x4cc   : > { %4440 = vmatpush3.msra.mxu1 %v3718_v22  ;;  %4406 = vmatprep.subr.mxu0 %v3701_v24  ;;  %v3681_v43 = vld [vmem:[%s6437_s7 + $0x18] sm:$0xff]  ;;  %v3680_v50 = vld [vmem:[%s6437_s7 + $0x10] sm:$0xff]  ;;  %v3679_v56 = vld [vmem:[%s6437_s7 + $0x8] sm:$0xff] }
 0x4cd   : > { %4441 = vmatprep.subr.mxu1 %v3733_v31  ;;  %4407 = vmatpush3.msra.mxu0 %v3685_v23  ;;  %v3713_v44 = vld [vmem:[%s6437_s7 + $0x118] sm:$0xff]  ;;  %v3712_v52 = vld [vmem:[%s6437_s7 + $0x110] sm:$0xff]  ;;  %v3711_v59 = vld [vmem:[%s6437_s7 + $0x108] sm:$0xff] }
 0x4ce   : > { %4442 = vmatpush3.msra.mxu1 %v3717_v25  ;;  %4408 = vmatprep.subr.mxu0 %v3700_v4  ;;  %v3677_v47 = vld [vmem:[#allocation3] sm:$0xf]  ;;  %v3694_v60 = vld [vmem:[%s6437_s7 + $0x80] sm:$0xff] }
 0x4cf   : > { %4443 = vmatprep.subr.mxu1 %v3732_v16  ;;  %4409 = vmatpush3.msra.mxu0 %v3684_v28  ;;  %v3726_v2 = vld [vmem:[%s6437_s7 + $0x180] sm:$0xff]  ;;  %v3751_v51 = vrot.slane %v3677_v47, %v3750_v49  ;;  %v3759_v7 = vrot.slane %v3677_v47, %v3758_v53  ;;  %v3747_v61 = vrot.slane %v3677_v47, %v3746_v45 }
 0x4d0   : > { %4444 = vmatpush3.msra.mxu1 %v3716_v29  ;;  %4410 = vmatprep.subr.mxu0 %v3699_v26  ;;  %v3678_v8 = vld [vmem:[%s6437_s7] sm:$0xff]  ;;  %v3755_v63 = vrot.slane %v3677_v47, %v3754_v57 }
 0x4d1   : > { %4445 = vmatprep.subr.mxu1 %v3731_v30  ;;  %4411 = vmatpush3.msra.mxu0 %v3683_v32  ;;  %v3710_v3 = vld [vmem:[%s6437_s7 + $0x100] sm:$0xff] }
 0x4d2   : > { %4446 = vmatpush3.msra.mxu1 %v3715_v37  ;;  %4412 = vmatprep.subr.mxu0 %v3698_v35  ;;  %v3742_v18 = vld [vmem:[%s6438_s8] sm:$0x1] }
 0x4d3   : > { %4447 = vmatprep.subr.mxu1 %v3730_v36  ;;  %4413 = vmatpush3.msra.mxu0 %v3682_v38 }
 0x4d4   : > { %4448 = vmatpush3.msra.mxu1 %v3714_v40  ;;  %4414 = vmatprep.subr.mxu0 %v3697_v39 }
 0x4d5   : > { %4449 = vmatprep.subr.mxu1 %v3729_v41  ;;  %4415 = vmatpush3.msra.mxu0 %v3681_v43 }
 0x4d6   : > { %4450 = vmatpush3.msra.mxu1 %v3713_v44  ;;  %4416 = vmatprep.subr.mxu0 %v3696_v46 }
 0x4d7   : > { %4451 = vmatprep.subr.mxu1 %v3728_v48  ;;  %4417 = vmatpush3.msra.mxu0 %v3680_v50 }
 0x4d8   : > { %4452 = vmatpush3.msra.mxu1 %v3712_v52  ;;  %4418 = vmatprep.subr.mxu0 %v3695_v54 }
 0x4d9   : > { %4453 = vmatprep.subr.mxu1 %v3727_v55  ;;  %4419 = vmatpush3.msra.mxu0 %v3679_v56 }
 0x4da   : > { %4454 = vmatpush3.msra.mxu1 %v3711_v59  ;;  %4420 = vmatprep.subr.mxu0 %v3694_v60 }
 0x4db   : > { %4455 = vmatprep.subr.mxu1 %v3726_v2  ;;  %4421 = vmatpush3.msra.mxu0 %v3678_v8 }
 0x4dc   : > { %3828 = vmatprep.mubr.f32.mxu0 %v3751_v51  ;;  %4456 = vmatpush3.msra.mxu1 %v3710_v3 }
 0x4dd   : > { %3898 = vmatprep.mubr.f32.mxu1 %v3759_v7  ;;  %3829 = vmatmul.mubr.f32.vlgmr.msra.gmra.mxu0 %v3747_v61 }
 0x4de   : > { %3899 = vmatmul.mubr.f32.vlgmr.msra.gmra.mxu1 %v3755_v63 }
 0x59d   : > { %v4422_v62 = vpop.f32.mrf.mxu0 }
 0x59e   : > { %v4457_v34 = vpop.f32.mrf.mxu1 }
 0x59f   : > { %v4423_v0 = vpop.f32.mrf.mxu0 }
 0x5a0   : > { %v4458_v1 = vpop.f32.mrf.mxu1  ;;  %v4424_v58 = vadd.f32 %v4423_v0, %v4422_v62 }
 0x5a1   : > { %v4459_v27 = vadd.f32 %v4458_v1, %v4457_v34 }
 0x5a2   : > { %v3831_v6 = vadd.f32 %v4424_v58, %v3742_v18 }
 0x5a4   : > { %v3901_v42 = vadd.f32 %v4459_v27, %v3831_v6 }
 0x5a6   : > { %v3913_v9 = vrot.slane %v3901_v42, 5  ;;  %v3905_v11 = vrot.slane %v3901_v42, 7  ;;  %v3909_v14 = vrot.slane %v3901_v42, 6 }
 0x5a8   : > { %3914 = vrot.lane.b32.xlu1 %v3913_v9, %s5273_s27  ;;  %3906 = vrot.lane.b32.xlu0 %v3905_v11, %s5274_s28 }
 0x5ac   : > { %3910 = vrot.lane.b32.xlu0 %v3909_v14, %s5275_s19 }
 0x61a   : > { %v3907_v10 = vpop.permute.xlu0 %3906  ;;  %v3915_v33 = vpop.permute.xlu1 %3914 }
 0x61b   : > { %v3918_v12 = vsel %vm3917_vm14, %v3901_v42, %v3907_v10 }
 0x61e   : > { %v3911_v15 = vpop.permute.xlu0 %3910 }
 0x61f   : > { %v3920_v5 = vsel %vm3919_vm6, %v3918_v12, %v3911_v15 }
 0x620   : > { %v3922_v17 = vsel %vm3921_vm7, %v3920_v5, %v3915_v33 }
 0x621   : > { %v3924_v19 = vsel %vm3923_vm4, %v3922_v17, -inf }
 0x622   : > { %3925 = vmax.xlane.f32.xlu1 %v3924_v19 }
 0x6ab   : > { %v3926_v20 = vpop.xlane.xlu1 %3925 }
 0x6ac   : > { %v3927_v13 = vsub.f32 %v3922_v17, %v3926_v20 }
 0x6ae   : > { %v3928_v21 = vmul.f32 1.442695, %v3927_v13 }
 0x6b0   : > { %5155 = vpow2.f32 %v3928_v21 }
 0x6bd   : > { %v5156_v22 = vpop.eup %5155 }
 0x6be   : > { %v3930_v24 = vsel %vm3923_vm4, %v5156_v22, 0.0 }
 0x6bf   : > { %3931 = vadd.xlane.f32.xlu0 %v3930_v24 }
 0x748   : > { %v3932_v31 = vpop.xlane.xlu0 %3931 }
 0x749   : > { %5157 = vrcp.f32 %v3932_v31 }
 0x756   : > { %v5158_v23 = vpop.eup %5157 }
 0x757   : > { %v3934_v25 = vmul.f32 %v5158_v23, %v5156_v22 }
 0x759   : > { %3935 = vst.msk [vmem:[#allocation7] sm:$0xf] %vm3923_vm4, %v3934_v25 }
 0x75a PF: > { %s5276_s18 = smov [#allocation7]  }
 0x75b   : > { %s3943_s20 = sshll.u32 %s5276_s18, 4  ;;  %s3944_s20 = int_to_ptr.vmem [resolvable:$true] %s3943_s20 }
 0x75c   : > { %s5187_s24 = scalar_lea.vmem %s3944_s20, 64  ;;  %p5194_p5 = scmp.lt.s32.totalorder %s3944_s20, %s3944_s20 }
 0x75d   : > { %p5188_p2 = scmp.ne.s32.totalorder %s3944_s20, %s5187_s24  ;;  %p5195_p6 = scmp.lt.s32.totalorder %s5187_s24, %s5187_s24 }
 0x75f   : > { %p5189_p3 = pnand %p5188_p2, %p1102_p8  ;;  %p5196_p10 = por %p5195_p6, %p5194_p5 }
 0x761   : > { %p5190_p4 = pneg %p5189_p3 }
 0x763   : > { %p5197_p12 = pnand %p5196_p10, %p5190_p4 }
 0x765   : > { %5200 = shalt.err (!%p5197_p12)
}
 0x766   : > { %4525 = dma.vmem_to_hbm [thread:$0]  (%p1102_p8), %s3944_s20, 64, %s6439_s9, [#allocation6]  }
 0x767   : > { %5232 = dma.done.wait (%p1102_p8), [#allocation6], 64  }
 0x768   : > { %5234 = vsyncadd (%p1102_p8), [#allocation6], 4294967232 }
 0x769 PF: > { %p20_p11 = scmp.ge.s32.totalorder %s5349_s14, 4   ;;  %s6493_s30 = smov %s5241_s10 }
 0x76a   : > { %s6494_s10 = smov %s5245_s11  ;;  %s6495_s11 = smov %s5359_s17 }
 0x76b   : > { %s6496_s12 = smov %s5349_s14  ;;  %22 = sbr.rel (!%p20_p11) target bundleno = 4 (0x4), region = 103 }
 0x770   :  { %3956 = vsyncpa [#allocation5], 1 }
 0x771   :  { %3958 = vsyncpa [#allocation5 + $0x1], 1 }
 0x772   :  { %3959 = vsyncpa [#allocation6], 1 }
 0x773   :  { %3961 = vsyncpa [#allocation6 + $0x1], 1 }

</bundles_post_ra>
